<compile_context>
chip_gen: v7x
topology: tpu7x:2x2x1
jax: 0.10.0
libtpu: 0.0.40
codegen_flags: <defaults>
</compile_context>

<pallas_src>
import math
import functools

import jax
import jax.numpy as jnp
from jax.experimental import pallas as pl
from jax.experimental.pallas import tpu as pltpu


# --------------------------------------------------------------------------
# kernel
# --------------------------------------------------------------------------

def _layernorm(x, gamma, beta, eps=1e-5):
    mu = jnp.mean(x, axis=-1, keepdims=True)
    var = jnp.mean((x - mu) ** 2, axis=-1, keepdims=True)
    return (x - mu) * jax.lax.rsqrt(var + eps) * gamma + beta


_N_PER_LAYER = 7  # w_qkv, wo, w1, w2, b_qkv, bf1, vecs


def fused_transformer_kernel(num_heads, num_layers, B, S, *refs):
    """Whole forward pass (all layers + out-projection) in one kernel.

    refs layout:
      [x] + [w_qkv, wo, w1, w2, b_qkv, bf1, vecs] * num_layers
          + [w_out, b_out] + [o_ref]
    """
    x_ref = refs[0]
    layer_refs = refs[1:1 + _N_PER_LAYER * num_layers]
    w_out_ref = refs[1 + _N_PER_LAYER * num_layers]
    b_out_ref = refs[2 + _N_PER_LAYER * num_layers]
    o_ref = refs[3 + _N_PER_LAYER * num_layers]

    x = x_ref[...]                              # (B*S, D) f32
    D = x.shape[-1]
    dk = D // num_heads
    scale = 1.0 / math.sqrt(dk)

    for li in range(num_layers):                # static unroll over layers
        (w_qkv_ref, wo_ref, w1_ref, w2_ref,
         b_qkv_ref, bf1_ref, vecs_ref) = layer_refs[
            _N_PER_LAYER * li:_N_PER_LAYER * (li + 1)]

        vecs = vecs_ref[...]                    # (6, D) f32
        bo = vecs[0:1, :]
        g1 = vecs[1:2, :]
        be1 = vecs[2:3, :]
        bf2 = vecs[3:4, :]
        g2 = vecs[4:5, :]
        be2 = vecs[5:6, :]

        # ---- fused QKV projection: one (B*S, D) @ (D, 3D) MXU pass ----
        qkv = jnp.dot(x.astype(jnp.bfloat16), w_qkv_ref[...],
                      preferred_element_type=jnp.float32) + b_qkv_ref[...]

        # ---- multi-head self attention (batched over B per head) ----
        head_outs = []
        for h in range(num_heads):              # static unroll over heads
            qh = qkv[:, h * dk:(h + 1) * dk].reshape(B, S, dk).astype(jnp.bfloat16)
            kh = qkv[:, D + h * dk:D + (h + 1) * dk].reshape(B, S, dk).astype(jnp.bfloat16)
            vh = qkv[:, 2 * D + h * dk:2 * D + (h + 1) * dk].reshape(B, S, dk).astype(jnp.bfloat16)

            s = jnp.einsum('bqd,bkd->bqk', qh, kh,
                           preferred_element_type=jnp.float32) * scale   # (B,S,S) f32
            s = s - jnp.max(s, axis=-1, keepdims=True)
            e = jnp.exp(s)
            inv = pl.reciprocal(jnp.sum(e, axis=-1, keepdims=True), approx=True)
            p = (e * inv).astype(jnp.bfloat16)
            ctx = jnp.einsum('bqk,bkd->bqd', p, vh,
                             preferred_element_type=jnp.float32)          # (B,S,dk)
            head_outs.append(ctx.reshape(B * S, dk))

        attn = jnp.concatenate(head_outs, axis=-1)                        # (B*S, D)
        attn_out = jnp.dot(attn.astype(jnp.bfloat16), wo_ref[...],
                           preferred_element_type=jnp.float32) + bo

        # residual + LayerNorm 1 (dropout = identity at inference)
        x1 = _layernorm(x + attn_out, g1, be1)

        # ---- FeedForward ----
        h1 = jnp.maximum(
            jnp.dot(x1.astype(jnp.bfloat16), w1_ref[...],
                    preferred_element_type=jnp.float32) + bf1_ref[...], 0.0)
        ffn = jnp.dot(h1.astype(jnp.bfloat16), w2_ref[...],
                      preferred_element_type=jnp.float32) + bf2

        # residual + LayerNorm 2
        x = _layernorm(x1 + ffn, g2, be2)

    # ---- final vocab projection (lane-dense: V is a multiple of 128) ----
    o_ref[...] = (jnp.dot(x.astype(jnp.bfloat16), w_out_ref[...],
                          preferred_element_type=jnp.float32) + b_out_ref[...])


# --------------------------------------------------------------------------
# wrapper
# --------------------------------------------------------------------------

def transformer_forward(tokens, params, pe, num_heads):
    # tokens: (B, S) int32
    B, S = tokens.shape
    D = params['embedding'].shape[1]
    V = params['w_out'].shape[1]
    num_layers = len(params['layers'])

    # glue: embedding gather + positional encoding (PyTorch ref does NOT scale
    # by sqrt(d_model) and passes no mask).
    x = jnp.take(params['embedding'], tokens, axis=0)          # (B, S, D)
    x = x + pe[None, :S, :]
    x2d = x.reshape(B * S, D).astype(jnp.float32)              # lane-dense slab

    flat = []
    for layer in params['layers']:
        flat += [layer['w_qkv'], layer['wo'], layer['w1'], layer['w2'],
                 layer['b_qkv'], layer['bf1'], layer['vecs']]
    flat += [params['w_out'], params['b_out']]

    kernel = functools.partial(fused_transformer_kernel,
                               num_heads, num_layers, B, S)
    out = pl.pallas_call(
        kernel,
        out_shape=jax.ShapeDtypeStruct((B * S, V), jnp.float32),
        # no grid: single invocation, every operand whole-array resident in VMEM
        compiler_params=pltpu.CompilerParams(vmem_limit_bytes=32 * 1024 * 1024),
    )(x2d, *flat)
    return out.reshape(B, S, V)


# --------------------------------------------------------------------------
# parameter init (deterministic, weights packed for the fused kernel)
# --------------------------------------------------------------------------

def make_positional_encoding(max_len, d_model):
    position = jnp.arange(max_len, dtype=jnp.float32)[:, None]
    div_term = jnp.exp(jnp.arange(0, d_model, 2, dtype=jnp.float32) *
                       (-math.log(10000.0) / d_model))
    pe = jnp.zeros((max_len, d_model), dtype=jnp.float32)
    pe = pe.at[:, 0::2].set(jnp.sin(position * div_term))
    pe = pe.at[:, 1::2].set(jnp.cos(position * div_term))
    return pe


def init_params(key, vocab_size, d_model, d_ff, num_layers):
    def dense(k, n_in, n_out):
        # stored as (in, out) == PyTorch W^T; bf16 for MXU, f32 accumulation
        return (0.02 * jax.random.normal(k, (n_in, n_out), jnp.float32)
                ).astype(jnp.bfloat16)

    keys = jax.random.split(key, 2 + num_layers)
    params = {
        'embedding': 0.02 * jax.random.normal(
            keys[0], (vocab_size, d_model), jnp.float32),
        'layers': [],
    }
    zeros = jnp.zeros((d_model,), jnp.float32)
    ones = jnp.ones((d_model,), jnp.float32)
    for li in range(num_layers):
        ks = jax.random.split(keys[1 + li], 6)
        wq = dense(ks[0], d_model, d_model)
        wk = dense(ks[1], d_model, d_model)
        wv = dense(ks[2], d_model, d_model)
        layer = {
            'w_qkv': jnp.concatenate([wq, wk, wv], axis=1),        # (D, 3D) bf16
            'wo':    dense(ks[3], d_model, d_model),               # (D, D)  bf16
            'w1':    dense(ks[4], d_model, d_ff),                  # (D, F)  bf16
            'w2':    dense(ks[5], d_ff, d_model),                  # (F, D)  bf16
            'b_qkv': jnp.zeros((1, 3 * d_model), jnp.float32),
            'bf1':   jnp.zeros((1, d_ff), jnp.float32),
            # packed small vectors: [bo, gamma1, beta1, bf2, gamma2, beta2]
            'vecs':  jnp.stack([zeros, ones, zeros, zeros, ones, zeros]),
        }
        params['layers'].append(layer)
    params['w_out'] = dense(keys[1 + num_layers], d_model, vocab_size)
    params['b_out'] = jnp.zeros((1, vocab_size), jnp.float32)
    return params


# --------------------------------------------------------------------------
# main
# --------------------------------------------------------------------------

if __name__ == "__main__":
    VOCAB = 128      # multiple of 128 -> lane-dense logits store
    D_MODEL = 64
    N_HEADS = 4
    D_FF = 128
    N_LAYERS = 2
    MAX_LEN = 64
    B, S = 2, 8

    key = jax.random.PRNGKey(0)
    k_param, k_tok = jax.random.split(key)

    params = init_params(k_param, VOCAB, D_MODEL, D_FF, N_LAYERS)
    pe = make_positional_encoding(MAX_LEN, D_MODEL)
    tokens = jax.random.randint(k_tok, (B, S), 0, VOCAB, dtype=jnp.int32)

    fwd = jax.jit(functools.partial(transformer_forward, num_heads=N_HEADS))
    logits = fwd(tokens, params, pe)
    logits = jax.block_until_ready(logits)

    assert logits.shape == (B, S, VOCAB)
    assert bool(jnp.all(jnp.isfinite(logits)))
    print("KERNEL_OK")
</pallas_src>

<mosaic_0001>
module attributes {stable_mosaic.version = 11 : i64} {
  func.func @fused_transformer_kernel(%arg0: memref<16x64xf32, #tpu.memory_space<vmem>>, %arg1: memref<64x192xbf16, #tpu.memory_space<vmem>>, %arg2: memref<64x64xbf16, #tpu.memory_space<vmem>>, %arg3: memref<64x128xbf16, #tpu.memory_space<vmem>>, %arg4: memref<128x64xbf16, #tpu.memory_space<vmem>>, %arg5: memref<1x192xf32, #tpu.memory_space<vmem>>, %arg6: memref<1x128xf32, #tpu.memory_space<vmem>>, %arg7: memref<6x64xf32, #tpu.memory_space<vmem>>, %arg8: memref<64x192xbf16, #tpu.memory_space<vmem>>, %arg9: memref<64x64xbf16, #tpu.memory_space<vmem>>, %arg10: memref<64x128xbf16, #tpu.memory_space<vmem>>, %arg11: memref<128x64xbf16, #tpu.memory_space<vmem>>, %arg12: memref<1x192xf32, #tpu.memory_space<vmem>>, %arg13: memref<1x128xf32, #tpu.memory_space<vmem>>, %arg14: memref<6x64xf32, #tpu.memory_space<vmem>>, %arg15: memref<64x128xbf16, #tpu.memory_space<vmem>>, %arg16: memref<1x128xf32, #tpu.memory_space<vmem>>, %arg17: memref<16x128xf32, #tpu.memory_space<vmem>>) attributes {dimension_semantics = [], scalar_prefetch = 0 : i64, scratch_operands = 0 : i64, tpu.core_type = #tpu.core_type<tc>} {
    %c0 = arith.constant 0 : index
    %c0_0 = arith.constant 0 : index
    %0 = vector.load %arg0[%c0, %c0_0] : memref<16x64xf32, #tpu.memory_space<vmem>>, vector<16x64xf32>
    %c0_1 = arith.constant 0 : index
    %c0_2 = arith.constant 0 : index
    %1 = vector.load %arg7[%c0_1, %c0_2] : memref<6x64xf32, #tpu.memory_space<vmem>>, vector<6x64xf32>
    %2 = vector.extract_strided_slice %1 {offsets = [0, 0], sizes = [1, 64], strides = [1, 1]} : vector<6x64xf32> to vector<1x64xf32>
    %3 = vector.extract_strided_slice %1 {offsets = [1, 0], sizes = [1, 64], strides = [1, 1]} : vector<6x64xf32> to vector<1x64xf32>
    %4 = vector.extract_strided_slice %1 {offsets = [2, 0], sizes = [1, 64], strides = [1, 1]} : vector<6x64xf32> to vector<1x64xf32>
    %5 = vector.extract_strided_slice %1 {offsets = [3, 0], sizes = [1, 64], strides = [1, 1]} : vector<6x64xf32> to vector<1x64xf32>
    %6 = vector.extract_strided_slice %1 {offsets = [4, 0], sizes = [1, 64], strides = [1, 1]} : vector<6x64xf32> to vector<1x64xf32>
    %7 = vector.extract_strided_slice %1 {offsets = [5, 0], sizes = [1, 64], strides = [1, 1]} : vector<6x64xf32> to vector<1x64xf32>
    %8 = arith.truncf %0 : vector<16x64xf32> to vector<16x64xbf16>
    %c0_3 = arith.constant 0 : index
    %c0_4 = arith.constant 0 : index
    %9 = vector.load %arg1[%c0_3, %c0_4] : memref<64x192xbf16, #tpu.memory_space<vmem>>, vector<64x192xbf16>
    %cst = arith.constant dense<0.000000e+00> : vector<16x192xf32>
    %10 = tpu.matmul %8, %9, %cst {dimension_numbers = #tpu.dot_dimension_numbers<[1], [0], [0], [1], [0, 0, 1, 1], [], []>} : vector<16x64xbf16>, vector<64x192xbf16>, vector<16x192xf32> -> vector<16x192xf32>
    %c0_5 = arith.constant 0 : index
    %c0_6 = arith.constant 0 : index
    %11 = vector.load %arg5[%c0_5, %c0_6] : memref<1x192xf32, #tpu.memory_space<vmem>>, vector<1x192xf32>
    %12 = vector.broadcast %11 : vector<1x192xf32> to vector<16x192xf32>
    %13 = arith.addf %10, %12 : vector<16x192xf32>
    %14 = vector.extract_strided_slice %13 {offsets = [0, 0], sizes = [16, 16], strides = [1, 1]} : vector<16x192xf32> to vector<16x16xf32>
    %15 = vector.shape_cast %14 : vector<16x16xf32> to vector<2x8x16xf32>
    %16 = arith.truncf %15 : vector<2x8x16xf32> to vector<2x8x16xbf16>
    %17 = vector.extract_strided_slice %13 {offsets = [0, 64], sizes = [16, 16], strides = [1, 1]} : vector<16x192xf32> to vector<16x16xf32>
    %18 = vector.shape_cast %17 : vector<16x16xf32> to vector<2x8x16xf32>
    %19 = arith.truncf %18 : vector<2x8x16xf32> to vector<2x8x16xbf16>
    %20 = vector.extract_strided_slice %13 {offsets = [0, 128], sizes = [16, 16], strides = [1, 1]} : vector<16x192xf32> to vector<16x16xf32>
    %21 = vector.shape_cast %20 : vector<16x16xf32> to vector<2x8x16xf32>
    %22 = arith.truncf %21 : vector<2x8x16xf32> to vector<2x8x16xbf16>
    "tpu.trace_start"() <{level = 10 : i32, message = "bqd,bkd->bqk"}> : () -> ()
    %cst_7 = arith.constant dense<0.000000e+00> : vector<2x8x8xf32>
    %23 = tpu.matmul %16, %19, %cst_7 {dimension_numbers = #tpu.dot_dimension_numbers<[2], [2], [1], [1], [0, 0, 0, 1, 1, 1], [0], [0]>} : vector<2x8x16xbf16>, vector<2x8x16xbf16>, vector<2x8x8xf32> -> vector<2x8x8xf32>
    "tpu.trace_stop"() : () -> ()
    %cst_8 = arith.constant 2.500000e-01 : f32
    %24 = vector.broadcast %cst_8 : f32 to vector<2x8x8xf32>
    %25 = arith.mulf %23, %24 : vector<2x8x8xf32>
    %cst_9 = arith.constant dense<0xFF800000> : vector<2x8xf32>
    %26 = vector.multi_reduction <maximumf>, %25, %cst_9 [2] : vector<2x8x8xf32> to vector<2x8xf32>
    %27 = vector.shape_cast %26 : vector<2x8xf32> to vector<2x8x1xf32>
    %28 = vector.broadcast %27 : vector<2x8x1xf32> to vector<2x8x8xf32>
    %29 = arith.subf %25, %28 : vector<2x8x8xf32>
    %30 = math.exp %29 : vector<2x8x8xf32>
    %cst_10 = arith.constant dense<0.000000e+00> : vector<2x8xf32>
    %31 = vector.multi_reduction <add>, %30, %cst_10 [2] : vector<2x8x8xf32> to vector<2x8xf32>
    %32 = vector.shape_cast %31 : vector<2x8xf32> to vector<2x8x1xf32>
    %33 = tpu.reciprocal %32 {approx = true} : vector<2x8x1xf32> -> vector<2x8x1xf32>
    %34 = vector.broadcast %33 : vector<2x8x1xf32> to vector<2x8x8xf32>
    %35 = arith.mulf %30, %34 : vector<2x8x8xf32>
    %36 = arith.truncf %35 : vector<2x8x8xf32> to vector<2x8x8xbf16>
    "tpu.trace_start"() <{level = 10 : i32, message = "bqk,bkd->bqd"}> : () -> ()
    %cst_11 = arith.constant dense<0.000000e+00> : vector<2x8x16xf32>
    %37 = tpu.matmul %36, %22, %cst_11 {dimension_numbers = #tpu.dot_dimension_numbers<[2], [1], [1], [2], [0, 0, 0, 1, 1, 2], [0], [0]>} : vector<2x8x8xbf16>, vector<2x8x16xbf16>, vector<2x8x16xf32> -> vector<2x8x16xf32>
    "tpu.trace_stop"() : () -> ()
    %38 = vector.shape_cast %37 : vector<2x8x16xf32> to vector<16x16xf32>
    %39 = vector.extract_strided_slice %13 {offsets = [0, 16], sizes = [16, 16], strides = [1, 1]} : vector<16x192xf32> to vector<16x16xf32>
    %40 = vector.shape_cast %39 : vector<16x16xf32> to vector<2x8x16xf32>
    %41 = arith.truncf %40 : vector<2x8x16xf32> to vector<2x8x16xbf16>
    %42 = vector.extract_strided_slice %13 {offsets = [0, 80], sizes = [16, 16], strides = [1, 1]} : vector<16x192xf32> to vector<16x16xf32>
    %43 = vector.shape_cast %42 : vector<16x16xf32> to vector<2x8x16xf32>
    %44 = arith.truncf %43 : vector<2x8x16xf32> to vector<2x8x16xbf16>
    %45 = vector.extract_strided_slice %13 {offsets = [0, 144], sizes = [16, 16], strides = [1, 1]} : vector<16x192xf32> to vector<16x16xf32>
    %46 = vector.shape_cast %45 : vector<16x16xf32> to vector<2x8x16xf32>
    %47 = arith.truncf %46 : vector<2x8x16xf32> to vector<2x8x16xbf16>
    "tpu.trace_start"() <{level = 10 : i32, message = "bqd,bkd->bqk"}> : () -> ()
    %cst_12 = arith.constant dense<0.000000e+00> : vector<2x8x8xf32>
    %48 = tpu.matmul %41, %44, %cst_12 {dimension_numbers = #tpu.dot_dimension_numbers<[2], [2], [1], [1], [0, 0, 0, 1, 1, 1], [0], [0]>} : vector<2x8x16xbf16>, vector<2x8x16xbf16>, vector<2x8x8xf32> -> vector<2x8x8xf32>
    "tpu.trace_stop"() : () -> ()
    %cst_13 = arith.constant 2.500000e-01 : f32
    %49 = vector.broadcast %cst_13 : f32 to vector<2x8x8xf32>
    %50 = arith.mulf %48, %49 : vector<2x8x8xf32>
    %cst_14 = arith.constant dense<0xFF800000> : vector<2x8xf32>
    %51 = vector.multi_reduction <maximumf>, %50, %cst_14 [2] : vector<2x8x8xf32> to vector<2x8xf32>
    %52 = vector.shape_cast %51 : vector<2x8xf32> to vector<2x8x1xf32>
    %53 = vector.broadcast %52 : vector<2x8x1xf32> to vector<2x8x8xf32>
    %54 = arith.subf %50, %53 : vector<2x8x8xf32>
    %55 = math.exp %54 : vector<2x8x8xf32>
    %cst_15 = arith.constant dense<0.000000e+00> : vector<2x8xf32>
    %56 = vector.multi_reduction <add>, %55, %cst_15 [2] : vector<2x8x8xf32> to vector<2x8xf32>
    %57 = vector.shape_cast %56 : vector<2x8xf32> to vector<2x8x1xf32>
    %58 = tpu.reciprocal %57 {approx = true} : vector<2x8x1xf32> -> vector<2x8x1xf32>
    %59 = vector.broadcast %58 : vector<2x8x1xf32> to vector<2x8x8xf32>
    %60 = arith.mulf %55, %59 : vector<2x8x8xf32>
    %61 = arith.truncf %60 : vector<2x8x8xf32> to vector<2x8x8xbf16>
    "tpu.trace_start"() <{level = 10 : i32, message = "bqk,bkd->bqd"}> : () -> ()
    %cst_16 = arith.constant dense<0.000000e+00> : vector<2x8x16xf32>
    %62 = tpu.matmul %61, %47, %cst_16 {dimension_numbers = #tpu.dot_dimension_numbers<[2], [1], [1], [2], [0, 0, 0, 1, 1, 2], [0], [0]>} : vector<2x8x8xbf16>, vector<2x8x16xbf16>, vector<2x8x16xf32> -> vector<2x8x16xf32>
    "tpu.trace_stop"() : () -> ()
    %63 = vector.shape_cast %62 : vector<2x8x16xf32> to vector<16x16xf32>
    %64 = vector.extract_strided_slice %13 {offsets = [0, 32], sizes = [16, 16], strides = [1, 1]} : vector<16x192xf32> to vector<16x16xf32>
    %65 = vector.shape_cast %64 : vector<16x16xf32> to vector<2x8x16xf32>
    %66 = arith.truncf %65 : vector<2x8x16xf32> to vector<2x8x16xbf16>
    %67 = vector.extract_strided_slice %13 {offsets = [0, 96], sizes = [16, 16], strides = [1, 1]} : vector<16x192xf32> to vector<16x16xf32>
    %68 = vector.shape_cast %67 : vector<16x16xf32> to vector<2x8x16xf32>
    %69 = arith.truncf %68 : vector<2x8x16xf32> to vector<2x8x16xbf16>
    %70 = vector.extract_strided_slice %13 {offsets = [0, 160], sizes = [16, 16], strides = [1, 1]} : vector<16x192xf32> to vector<16x16xf32>
    %71 = vector.shape_cast %70 : vector<16x16xf32> to vector<2x8x16xf32>
    %72 = arith.truncf %71 : vector<2x8x16xf32> to vector<2x8x16xbf16>
    "tpu.trace_start"() <{level = 10 : i32, message = "bqd,bkd->bqk"}> : () -> ()
    %cst_17 = arith.constant dense<0.000000e+00> : vector<2x8x8xf32>
    %73 = tpu.matmul %66, %69, %cst_17 {dimension_numbers = #tpu.dot_dimension_numbers<[2], [2], [1], [1], [0, 0, 0, 1, 1, 1], [0], [0]>} : vector<2x8x16xbf16>, vector<2x8x16xbf16>, vector<2x8x8xf32> -> vector<2x8x8xf32>
    "tpu.trace_stop"() : () -> ()
    %cst_18 = arith.constant 2.500000e-01 : f32
    %74 = vector.broadcast %cst_18 : f32 to vector<2x8x8xf32>
    %75 = arith.mulf %73, %74 : vector<2x8x8xf32>
    %cst_19 = arith.constant dense<0xFF800000> : vector<2x8xf32>
    %76 = vector.multi_reduction <maximumf>, %75, %cst_19 [2] : vector<2x8x8xf32> to vector<2x8xf32>
    %77 = vector.shape_cast %76 : vector<2x8xf32> to vector<2x8x1xf32>
    %78 = vector.broadcast %77 : vector<2x8x1xf32> to vector<2x8x8xf32>
    %79 = arith.subf %75, %78 : vector<2x8x8xf32>
    %80 = math.exp %79 : vector<2x8x8xf32>
    %cst_20 = arith.constant dense<0.000000e+00> : vector<2x8xf32>
    %81 = vector.multi_reduction <add>, %80, %cst_20 [2] : vector<2x8x8xf32> to vector<2x8xf32>
    %82 = vector.shape_cast %81 : vector<2x8xf32> to vector<2x8x1xf32>
    %83 = tpu.reciprocal %82 {approx = true} : vector<2x8x1xf32> -> vector<2x8x1xf32>
    %84 = vector.broadcast %83 : vector<2x8x1xf32> to vector<2x8x8xf32>
    %85 = arith.mulf %80, %84 : vector<2x8x8xf32>
    %86 = arith.truncf %85 : vector<2x8x8xf32> to vector<2x8x8xbf16>
    "tpu.trace_start"() <{level = 10 : i32, message = "bqk,bkd->bqd"}> : () -> ()
    %cst_21 = arith.constant dense<0.000000e+00> : vector<2x8x16xf32>
    %87 = tpu.matmul %86, %72, %cst_21 {dimension_numbers = #tpu.dot_dimension_numbers<[2], [1], [1], [2], [0, 0, 0, 1, 1, 2], [0], [0]>} : vector<2x8x8xbf16>, vector<2x8x16xbf16>, vector<2x8x16xf32> -> vector<2x8x16xf32>
    "tpu.trace_stop"() : () -> ()
    %88 = vector.shape_cast %87 : vector<2x8x16xf32> to vector<16x16xf32>
    %89 = vector.extract_strided_slice %13 {offsets = [0, 48], sizes = [16, 16], strides = [1, 1]} : vector<16x192xf32> to vector<16x16xf32>
    %90 = vector.shape_cast %89 : vector<16x16xf32> to vector<2x8x16xf32>
    %91 = arith.truncf %90 : vector<2x8x16xf32> to vector<2x8x16xbf16>
    %92 = vector.extract_strided_slice %13 {offsets = [0, 112], sizes = [16, 16], strides = [1, 1]} : vector<16x192xf32> to vector<16x16xf32>
    %93 = vector.shape_cast %92 : vector<16x16xf32> to vector<2x8x16xf32>
    %94 = arith.truncf %93 : vector<2x8x16xf32> to vector<2x8x16xbf16>
    %95 = vector.extract_strided_slice %13 {offsets = [0, 176], sizes = [16, 16], strides = [1, 1]} : vector<16x192xf32> to vector<16x16xf32>
    %96 = vector.shape_cast %95 : vector<16x16xf32> to vector<2x8x16xf32>
    %97 = arith.truncf %96 : vector<2x8x16xf32> to vector<2x8x16xbf16>
    "tpu.trace_start"() <{level = 10 : i32, message = "bqd,bkd->bqk"}> : () -> ()
    %cst_22 = arith.constant dense<0.000000e+00> : vector<2x8x8xf32>
    %98 = tpu.matmul %91, %94, %cst_22 {dimension_numbers = #tpu.dot_dimension_numbers<[2], [2], [1], [1], [0, 0, 0, 1, 1, 1], [0], [0]>} : vector<2x8x16xbf16>, vector<2x8x16xbf16>, vector<2x8x8xf32> -> vector<2x8x8xf32>
    "tpu.trace_stop"() : () -> ()
    %cst_23 = arith.constant 2.500000e-01 : f32
    %99 = vector.broadcast %cst_23 : f32 to vector<2x8x8xf32>
    %100 = arith.mulf %98, %99 : vector<2x8x8xf32>
    %cst_24 = arith.constant dense<0xFF800000> : vector<2x8xf32>
    %101 = vector.multi_reduction <maximumf>, %100, %cst_24 [2] : vector<2x8x8xf32> to vector<2x8xf32>
    %102 = vector.shape_cast %101 : vector<2x8xf32> to vector<2x8x1xf32>
    %103 = vector.broadcast %102 : vector<2x8x1xf32> to vector<2x8x8xf32>
    %104 = arith.subf %100, %103 : vector<2x8x8xf32>
    %105 = math.exp %104 : vector<2x8x8xf32>
    %cst_25 = arith.constant dense<0.000000e+00> : vector<2x8xf32>
    %106 = vector.multi_reduction <add>, %105, %cst_25 [2] : vector<2x8x8xf32> to vector<2x8xf32>
    %107 = vector.shape_cast %106 : vector<2x8xf32> to vector<2x8x1xf32>
    %108 = tpu.reciprocal %107 {approx = true} : vector<2x8x1xf32> -> vector<2x8x1xf32>
    %109 = vector.broadcast %108 : vector<2x8x1xf32> to vector<2x8x8xf32>
    %110 = arith.mulf %105, %109 : vector<2x8x8xf32>
    %111 = arith.truncf %110 : vector<2x8x8xf32> to vector<2x8x8xbf16>
    "tpu.trace_start"() <{level = 10 : i32, message = "bqk,bkd->bqd"}> : () -> ()
    %cst_26 = arith.constant dense<0.000000e+00> : vector<2x8x16xf32>
    %112 = tpu.matmul %111, %97, %cst_26 {dimension_numbers = #tpu.dot_dimension_numbers<[2], [1], [1], [2], [0, 0, 0, 1, 1, 2], [0], [0]>} : vector<2x8x8xbf16>, vector<2x8x16xbf16>, vector<2x8x16xf32> -> vector<2x8x16xf32>
    "tpu.trace_stop"() : () -> ()
    %113 = vector.shape_cast %112 : vector<2x8x16xf32> to vector<16x16xf32>
    %114 = tpu.concatenate %38, %63, %88, %113 in 1 : vector<16x16xf32>, vector<16x16xf32>, vector<16x16xf32>, vector<16x16xf32> -> vector<16x64xf32>
    %115 = arith.truncf %114 : vector<16x64xf32> to vector<16x64xbf16>
    %c0_27 = arith.constant 0 : index
    %c0_28 = arith.constant 0 : index
    %116 = vector.load %arg2[%c0_27, %c0_28] : memref<64x64xbf16, #tpu.memory_space<vmem>>, vector<64x64xbf16>
    %cst_29 = arith.constant dense<0.000000e+00> : vector<16x64xf32>
    %117 = tpu.matmul %115, %116, %cst_29 {dimension_numbers = #tpu.dot_dimension_numbers<[1], [0], [0], [1], [0, 0, 1, 1], [], []>} : vector<16x64xbf16>, vector<64x64xbf16>, vector<16x64xf32> -> vector<16x64xf32>
    %118 = vector.broadcast %2 : vector<1x64xf32> to vector<16x64xf32>
    %119 = arith.addf %117, %118 : vector<16x64xf32>
    %120 = arith.addf %0, %119 : vector<16x64xf32>
    %cst_30 = arith.constant dense<0.000000e+00> : vector<16xf32>
    %121 = vector.multi_reduction <add>, %120, %cst_30 [1] : vector<16x64xf32> to vector<16xf32>
    %122 = vector.shape_cast %121 : vector<16xf32> to vector<16x1xf32>
    %cst_31 = arith.constant 6.400000e+01 : f32
    %123 = vector.broadcast %cst_31 : f32 to vector<16x1xf32>
    %124 = arith.divf %122, %123 : vector<16x1xf32>
    %125 = vector.broadcast %124 : vector<16x1xf32> to vector<16x64xf32>
    %126 = arith.subf %120, %125 : vector<16x64xf32>
    %127 = arith.mulf %126, %126 : vector<16x64xf32>
    %cst_32 = arith.constant dense<0.000000e+00> : vector<16xf32>
    %128 = vector.multi_reduction <add>, %127, %cst_32 [1] : vector<16x64xf32> to vector<16xf32>
    %129 = vector.shape_cast %128 : vector<16xf32> to vector<16x1xf32>
    %cst_33 = arith.constant 6.400000e+01 : f32
    %130 = vector.broadcast %cst_33 : f32 to vector<16x1xf32>
    %131 = arith.divf %129, %130 : vector<16x1xf32>
    %132 = vector.broadcast %124 : vector<16x1xf32> to vector<16x64xf32>
    %133 = arith.subf %120, %132 : vector<16x64xf32>
    %cst_34 = arith.constant 9.99999974E-6 : f32
    %134 = vector.broadcast %cst_34 : f32 to vector<16x1xf32>
    %135 = arith.addf %131, %134 : vector<16x1xf32>
    %136 = math.rsqrt %135 : vector<16x1xf32>
    %137 = vector.broadcast %136 : vector<16x1xf32> to vector<16x64xf32>
    %138 = arith.mulf %133, %137 : vector<16x64xf32>
    %139 = vector.broadcast %3 : vector<1x64xf32> to vector<16x64xf32>
    %140 = arith.mulf %138, %139 : vector<16x64xf32>
    %141 = vector.broadcast %4 : vector<1x64xf32> to vector<16x64xf32>
    %142 = arith.addf %140, %141 : vector<16x64xf32>
    %143 = arith.truncf %142 : vector<16x64xf32> to vector<16x64xbf16>
    %c0_35 = arith.constant 0 : index
    %c0_36 = arith.constant 0 : index
    %144 = vector.load %arg3[%c0_35, %c0_36] : memref<64x128xbf16, #tpu.memory_space<vmem>>, vector<64x128xbf16>
    %cst_37 = arith.constant dense<0.000000e+00> : vector<16x128xf32>
    %145 = tpu.matmul %143, %144, %cst_37 {dimension_numbers = #tpu.dot_dimension_numbers<[1], [0], [0], [1], [0, 0, 1, 1], [], []>} : vector<16x64xbf16>, vector<64x128xbf16>, vector<16x128xf32> -> vector<16x128xf32>
    %c0_38 = arith.constant 0 : index
    %c0_39 = arith.constant 0 : index
    %146 = vector.load %arg6[%c0_38, %c0_39] : memref<1x128xf32, #tpu.memory_space<vmem>>, vector<1x128xf32>
    %147 = vector.broadcast %146 : vector<1x128xf32> to vector<16x128xf32>
    %148 = arith.addf %145, %147 : vector<16x128xf32>
    %cst_40 = arith.constant 0.000000e+00 : f32
    %149 = vector.broadcast %cst_40 : f32 to vector<16x128xf32>
    %150 = arith.maximumf %148, %149 : vector<16x128xf32>
    %151 = arith.truncf %150 : vector<16x128xf32> to vector<16x128xbf16>
    %c0_41 = arith.constant 0 : index
    %c0_42 = arith.constant 0 : index
    %152 = vector.load %arg4[%c0_41, %c0_42] : memref<128x64xbf16, #tpu.memory_space<vmem>>, vector<128x64xbf16>
    %cst_43 = arith.constant dense<0.000000e+00> : vector<16x64xf32>
    %153 = tpu.matmul %151, %152, %cst_43 {dimension_numbers = #tpu.dot_dimension_numbers<[1], [0], [0], [1], [0, 0, 1, 1], [], []>} : vector<16x128xbf16>, vector<128x64xbf16>, vector<16x64xf32> -> vector<16x64xf32>
    %154 = vector.broadcast %5 : vector<1x64xf32> to vector<16x64xf32>
    %155 = arith.addf %153, %154 : vector<16x64xf32>
    %156 = arith.addf %142, %155 : vector<16x64xf32>
    %cst_44 = arith.constant dense<0.000000e+00> : vector<16xf32>
    %157 = vector.multi_reduction <add>, %156, %cst_44 [1] : vector<16x64xf32> to vector<16xf32>
    %158 = vector.shape_cast %157 : vector<16xf32> to vector<16x1xf32>
    %cst_45 = arith.constant 6.400000e+01 : f32
    %159 = vector.broadcast %cst_45 : f32 to vector<16x1xf32>
    %160 = arith.divf %158, %159 : vector<16x1xf32>
    %161 = vector.broadcast %160 : vector<16x1xf32> to vector<16x64xf32>
    %162 = arith.subf %156, %161 : vector<16x64xf32>
    %163 = arith.mulf %162, %162 : vector<16x64xf32>
    %cst_46 = arith.constant dense<0.000000e+00> : vector<16xf32>
    %164 = vector.multi_reduction <add>, %163, %cst_46 [1] : vector<16x64xf32> to vector<16xf32>
    %165 = vector.shape_cast %164 : vector<16xf32> to vector<16x1xf32>
    %cst_47 = arith.constant 6.400000e+01 : f32
    %166 = vector.broadcast %cst_47 : f32 to vector<16x1xf32>
    %167 = arith.divf %165, %166 : vector<16x1xf32>
    %168 = vector.broadcast %160 : vector<16x1xf32> to vector<16x64xf32>
    %169 = arith.subf %156, %168 : vector<16x64xf32>
    %cst_48 = arith.constant 9.99999974E-6 : f32
    %170 = vector.broadcast %cst_48 : f32 to vector<16x1xf32>
    %171 = arith.addf %167, %170 : vector<16x1xf32>
    %172 = math.rsqrt %171 : vector<16x1xf32>
    %173 = vector.broadcast %172 : vector<16x1xf32> to vector<16x64xf32>
    %174 = arith.mulf %169, %173 : vector<16x64xf32>
    %175 = vector.broadcast %6 : vector<1x64xf32> to vector<16x64xf32>
    %176 = arith.mulf %174, %175 : vector<16x64xf32>
    %177 = vector.broadcast %7 : vector<1x64xf32> to vector<16x64xf32>
    %178 = arith.addf %176, %177 : vector<16x64xf32>
    %c0_49 = arith.constant 0 : index
    %c0_50 = arith.constant 0 : index
    %179 = vector.load %arg14[%c0_49, %c0_50] : memref<6x64xf32, #tpu.memory_space<vmem>>, vector<6x64xf32>
    %180 = vector.extract_strided_slice %179 {offsets = [0, 0], sizes = [1, 64], strides = [1, 1]} : vector<6x64xf32> to vector<1x64xf32>
    %181 = vector.extract_strided_slice %179 {offsets = [1, 0], sizes = [1, 64], strides = [1, 1]} : vector<6x64xf32> to vector<1x64xf32>
    %182 = vector.extract_strided_slice %179 {offsets = [2, 0], sizes = [1, 64], strides = [1, 1]} : vector<6x64xf32> to vector<1x64xf32>
    %183 = vector.extract_strided_slice %179 {offsets = [3, 0], sizes = [1, 64], strides = [1, 1]} : vector<6x64xf32> to vector<1x64xf32>
    %184 = vector.extract_strided_slice %179 {offsets = [4, 0], sizes = [1, 64], strides = [1, 1]} : vector<6x64xf32> to vector<1x64xf32>
    %185 = vector.extract_strided_slice %179 {offsets = [5, 0], sizes = [1, 64], strides = [1, 1]} : vector<6x64xf32> to vector<1x64xf32>
    %186 = arith.truncf %178 : vector<16x64xf32> to vector<16x64xbf16>
    %c0_51 = arith.constant 0 : index
    %c0_52 = arith.constant 0 : index
    %187 = vector.load %arg8[%c0_51, %c0_52] : memref<64x192xbf16, #tpu.memory_space<vmem>>, vector<64x192xbf16>
    %cst_53 = arith.constant dense<0.000000e+00> : vector<16x192xf32>
    %188 = tpu.matmul %186, %187, %cst_53 {dimension_numbers = #tpu.dot_dimension_numbers<[1], [0], [0], [1], [0, 0, 1, 1], [], []>} : vector<16x64xbf16>, vector<64x192xbf16>, vector<16x192xf32> -> vector<16x192xf32>
    %c0_54 = arith.constant 0 : index
    %c0_55 = arith.constant 0 : index
    %189 = vector.load %arg12[%c0_54, %c0_55] : memref<1x192xf32, #tpu.memory_space<vmem>>, vector<1x192xf32>
    %190 = vector.broadcast %189 : vector<1x192xf32> to vector<16x192xf32>
    %191 = arith.addf %188, %190 : vector<16x192xf32>
    %192 = vector.extract_strided_slice %191 {offsets = [0, 0], sizes = [16, 16], strides = [1, 1]} : vector<16x192xf32> to vector<16x16xf32>
    %193 = vector.shape_cast %192 : vector<16x16xf32> to vector<2x8x16xf32>
    %194 = arith.truncf %193 : vector<2x8x16xf32> to vector<2x8x16xbf16>
    %195 = vector.extract_strided_slice %191 {offsets = [0, 64], sizes = [16, 16], strides = [1, 1]} : vector<16x192xf32> to vector<16x16xf32>
    %196 = vector.shape_cast %195 : vector<16x16xf32> to vector<2x8x16xf32>
    %197 = arith.truncf %196 : vector<2x8x16xf32> to vector<2x8x16xbf16>
    %198 = vector.extract_strided_slice %191 {offsets = [0, 128], sizes = [16, 16], strides = [1, 1]} : vector<16x192xf32> to vector<16x16xf32>
    %199 = vector.shape_cast %198 : vector<16x16xf32> to vector<2x8x16xf32>
    %200 = arith.truncf %199 : vector<2x8x16xf32> to vector<2x8x16xbf16>
    "tpu.trace_start"() <{level = 10 : i32, message = "bqd,bkd->bqk"}> : () -> ()
    %cst_56 = arith.constant dense<0.000000e+00> : vector<2x8x8xf32>
    %201 = tpu.matmul %194, %197, %cst_56 {dimension_numbers = #tpu.dot_dimension_numbers<[2], [2], [1], [1], [0, 0, 0, 1, 1, 1], [0], [0]>} : vector<2x8x16xbf16>, vector<2x8x16xbf16>, vector<2x8x8xf32> -> vector<2x8x8xf32>
    "tpu.trace_stop"() : () -> ()
    %cst_57 = arith.constant 2.500000e-01 : f32
    %202 = vector.broadcast %cst_57 : f32 to vector<2x8x8xf32>
    %203 = arith.mulf %201, %202 : vector<2x8x8xf32>
    %cst_58 = arith.constant dense<0xFF800000> : vector<2x8xf32>
    %204 = vector.multi_reduction <maximumf>, %203, %cst_58 [2] : vector<2x8x8xf32> to vector<2x8xf32>
    %205 = vector.shape_cast %204 : vector<2x8xf32> to vector<2x8x1xf32>
    %206 = vector.broadcast %205 : vector<2x8x1xf32> to vector<2x8x8xf32>
    %207 = arith.subf %203, %206 : vector<2x8x8xf32>
    %208 = math.exp %207 : vector<2x8x8xf32>
    %cst_59 = arith.constant dense<0.000000e+00> : vector<2x8xf32>
    %209 = vector.multi_reduction <add>, %208, %cst_59 [2] : vector<2x8x8xf32> to vector<2x8xf32>
    %210 = vector.shape_cast %209 : vector<2x8xf32> to vector<2x8x1xf32>
    %211 = tpu.reciprocal %210 {approx = true} : vector<2x8x1xf32> -> vector<2x8x1xf32>
    %212 = vector.broadcast %211 : vector<2x8x1xf32> to vector<2x8x8xf32>
    %213 = arith.mulf %208, %212 : vector<2x8x8xf32>
    %214 = arith.truncf %213 : vector<2x8x8xf32> to vector<2x8x8xbf16>
    "tpu.trace_start"() <{level = 10 : i32, message = "bqk,bkd->bqd"}> : () -> ()
    %cst_60 = arith.constant dense<0.000000e+00> : vector<2x8x16xf32>
    %215 = tpu.matmul %214, %200, %cst_60 {dimension_numbers = #tpu.dot_dimension_numbers<[2], [1], [1], [2], [0, 0, 0, 1, 1, 2], [0], [0]>} : vector<2x8x8xbf16>, vector<2x8x16xbf16>, vector<2x8x16xf32> -> vector<2x8x16xf32>
    "tpu.trace_stop"() : () -> ()
    %216 = vector.shape_cast %215 : vector<2x8x16xf32> to vector<16x16xf32>
    %217 = vector.extract_strided_slice %191 {offsets = [0, 16], sizes = [16, 16], strides = [1, 1]} : vector<16x192xf32> to vector<16x16xf32>
    %218 = vector.shape_cast %217 : vector<16x16xf32> to vector<2x8x16xf32>
    %219 = arith.truncf %218 : vector<2x8x16xf32> to vector<2x8x16xbf16>
    %220 = vector.extract_strided_slice %191 {offsets = [0, 80], sizes = [16, 16], strides = [1, 1]} : vector<16x192xf32> to vector<16x16xf32>
    %221 = vector.shape_cast %220 : vector<16x16xf32> to vector<2x8x16xf32>
    %222 = arith.truncf %221 : vector<2x8x16xf32> to vector<2x8x16xbf16>
    %223 = vector.extract_strided_slice %191 {offsets = [0, 144], sizes = [16, 16], strides = [1, 1]} : vector<16x192xf32> to vector<16x16xf32>
    %224 = vector.shape_cast %223 : vector<16x16xf32> to vector<2x8x16xf32>
    %225 = arith.truncf %224 : vector<2x8x16xf32> to vector<2x8x16xbf16>
    "tpu.trace_start"() <{level = 10 : i32, message = "bqd,bkd->bqk"}> : () -> ()
    %cst_61 = arith.constant dense<0.000000e+00> : vector<2x8x8xf32>
    %226 = tpu.matmul %219, %222, %cst_61 {dimension_numbers = #tpu.dot_dimension_numbers<[2], [2], [1], [1], [0, 0, 0, 1, 1, 1], [0], [0]>} : vector<2x8x16xbf16>, vector<2x8x16xbf16>, vector<2x8x8xf32> -> vector<2x8x8xf32>
    "tpu.trace_stop"() : () -> ()
    %cst_62 = arith.constant 2.500000e-01 : f32
    %227 = vector.broadcast %cst_62 : f32 to vector<2x8x8xf32>
    %228 = arith.mulf %226, %227 : vector<2x8x8xf32>
    %cst_63 = arith.constant dense<0xFF800000> : vector<2x8xf32>
    %229 = vector.multi_reduction <maximumf>, %228, %cst_63 [2] : vector<2x8x8xf32> to vector<2x8xf32>
    %230 = vector.shape_cast %229 : vector<2x8xf32> to vector<2x8x1xf32>
    %231 = vector.broadcast %230 : vector<2x8x1xf32> to vector<2x8x8xf32>
    %232 = arith.subf %228, %231 : vector<2x8x8xf32>
    %233 = math.exp %232 : vector<2x8x8xf32>
    %cst_64 = arith.constant dense<0.000000e+00> : vector<2x8xf32>
    %234 = vector.multi_reduction <add>, %233, %cst_64 [2] : vector<2x8x8xf32> to vector<2x8xf32>
    %235 = vector.shape_cast %234 : vector<2x8xf32> to vector<2x8x1xf32>
    %236 = tpu.reciprocal %235 {approx = true} : vector<2x8x1xf32> -> vector<2x8x1xf32>
    %237 = vector.broadcast %236 : vector<2x8x1xf32> to vector<2x8x8xf32>
    %238 = arith.mulf %233, %237 : vector<2x8x8xf32>
    %239 = arith.truncf %238 : vector<2x8x8xf32> to vector<2x8x8xbf16>
    "tpu.trace_start"() <{level = 10 : i32, message = "bqk,bkd->bqd"}> : () -> ()
    %cst_65 = arith.constant dense<0.000000e+00> : vector<2x8x16xf32>
    %240 = tpu.matmul %239, %225, %cst_65 {dimension_numbers = #tpu.dot_dimension_numbers<[2], [1], [1], [2], [0, 0, 0, 1, 1, 2], [0], [0]>} : vector<2x8x8xbf16>, vector<2x8x16xbf16>, vector<2x8x16xf32> -> vector<2x8x16xf32>
    "tpu.trace_stop"() : () -> ()
    %241 = vector.shape_cast %240 : vector<2x8x16xf32> to vector<16x16xf32>
    %242 = vector.extract_strided_slice %191 {offsets = [0, 32], sizes = [16, 16], strides = [1, 1]} : vector<16x192xf32> to vector<16x16xf32>
    %243 = vector.shape_cast %242 : vector<16x16xf32> to vector<2x8x16xf32>
    %244 = arith.truncf %243 : vector<2x8x16xf32> to vector<2x8x16xbf16>
    %245 = vector.extract_strided_slice %191 {offsets = [0, 96], sizes = [16, 16], strides = [1, 1]} : vector<16x192xf32> to vector<16x16xf32>
    %246 = vector.shape_cast %245 : vector<16x16xf32> to vector<2x8x16xf32>
    %247 = arith.truncf %246 : vector<2x8x16xf32> to vector<2x8x16xbf16>
    %248 = vector.extract_strided_slice %191 {offsets = [0, 160], sizes = [16, 16], strides = [1, 1]} : vector<16x192xf32> to vector<16x16xf32>
    %249 = vector.shape_cast %248 : vector<16x16xf32> to vector<2x8x16xf32>
    %250 = arith.truncf %249 : vector<2x8x16xf32> to vector<2x8x16xbf16>
    "tpu.trace_start"() <{level = 10 : i32, message = "bqd,bkd->bqk"}> : () -> ()
    %cst_66 = arith.constant dense<0.000000e+00> : vector<2x8x8xf32>
    %251 = tpu.matmul %244, %247, %cst_66 {dimension_numbers = #tpu.dot_dimension_numbers<[2], [2], [1], [1], [0, 0, 0, 1, 1, 1], [0], [0]>} : vector<2x8x16xbf16>, vector<2x8x16xbf16>, vector<2x8x8xf32> -> vector<2x8x8xf32>
    "tpu.trace_stop"() : () -> ()
    %cst_67 = arith.constant 2.500000e-01 : f32
    %252 = vector.broadcast %cst_67 : f32 to vector<2x8x8xf32>
    %253 = arith.mulf %251, %252 : vector<2x8x8xf32>
    %cst_68 = arith.constant dense<0xFF800000> : vector<2x8xf32>
    %254 = vector.multi_reduction <maximumf>, %253, %cst_68 [2] : vector<2x8x8xf32> to vector<2x8xf32>
    %255 = vector.shape_cast %254 : vector<2x8xf32> to vector<2x8x1xf32>
    %256 = vector.broadcast %255 : vector<2x8x1xf32> to vector<2x8x8xf32>
    %257 = arith.subf %253, %256 : vector<2x8x8xf32>
    %258 = math.exp %257 : vector<2x8x8xf32>
    %cst_69 = arith.constant dense<0.000000e+00> : vector<2x8xf32>
    %259 = vector.multi_reduction <add>, %258, %cst_69 [2] : vector<2x8x8xf32> to vector<2x8xf32>
    %260 = vector.shape_cast %259 : vector<2x8xf32> to vector<2x8x1xf32>
    %261 = tpu.reciprocal %260 {approx = true} : vector<2x8x1xf32> -> vector<2x8x1xf32>
    %262 = vector.broadcast %261 : vector<2x8x1xf32> to vector<2x8x8xf32>
    %263 = arith.mulf %258, %262 : vector<2x8x8xf32>
    %264 = arith.truncf %263 : vector<2x8x8xf32> to vector<2x8x8xbf16>
    "tpu.trace_start"() <{level = 10 : i32, message = "bqk,bkd->bqd"}> : () -> ()
    %cst_70 = arith.constant dense<0.000000e+00> : vector<2x8x16xf32>
    %265 = tpu.matmul %264, %250, %cst_70 {dimension_numbers = #tpu.dot_dimension_numbers<[2], [1], [1], [2], [0, 0, 0, 1, 1, 2], [0], [0]>} : vector<2x8x8xbf16>, vector<2x8x16xbf16>, vector<2x8x16xf32> -> vector<2x8x16xf32>
    "tpu.trace_stop"() : () -> ()
    %266 = vector.shape_cast %265 : vector<2x8x16xf32> to vector<16x16xf32>
    %267 = vector.extract_strided_slice %191 {offsets = [0, 48], sizes = [16, 16], strides = [1, 1]} : vector<16x192xf32> to vector<16x16xf32>
    %268 = vector.shape_cast %267 : vector<16x16xf32> to vector<2x8x16xf32>
    %269 = arith.truncf %268 : vector<2x8x16xf32> to vector<2x8x16xbf16>
    %270 = vector.extract_strided_slice %191 {offsets = [0, 112], sizes = [16, 16], strides = [1, 1]} : vector<16x192xf32> to vector<16x16xf32>
    %271 = vector.shape_cast %270 : vector<16x16xf32> to vector<2x8x16xf32>
    %272 = arith.truncf %271 : vector<2x8x16xf32> to vector<2x8x16xbf16>
    %273 = vector.extract_strided_slice %191 {offsets = [0, 176], sizes = [16, 16], strides = [1, 1]} : vector<16x192xf32> to vector<16x16xf32>
    %274 = vector.shape_cast %273 : vector<16x16xf32> to vector<2x8x16xf32>
    %275 = arith.truncf %274 : vector<2x8x16xf32> to vector<2x8x16xbf16>
    "tpu.trace_start"() <{level = 10 : i32, message = "bqd,bkd->bqk"}> : () -> ()
    %cst_71 = arith.constant dense<0.000000e+00> : vector<2x8x8xf32>
    %276 = tpu.matmul %269, %272, %cst_71 {dimension_numbers = #tpu.dot_dimension_numbers<[2], [2], [1], [1], [0, 0, 0, 1, 1, 1], [0], [0]>} : vector<2x8x16xbf16>, vector<2x8x16xbf16>, vector<2x8x8xf32> -> vector<2x8x8xf32>
    "tpu.trace_stop"() : () -> ()
    %cst_72 = arith.constant 2.500000e-01 : f32
    %277 = vector.broadcast %cst_72 : f32 to vector<2x8x8xf32>
    %278 = arith.mulf %276, %277 : vector<2x8x8xf32>
    %cst_73 = arith.constant dense<0xFF800000> : vector<2x8xf32>
    %279 = vector.multi_reduction <maximumf>, %278, %cst_73 [2] : vector<2x8x8xf32> to vector<2x8xf32>
    %280 = vector.shape_cast %279 : vector<2x8xf32> to vector<2x8x1xf32>
    %281 = vector.broadcast %280 : vector<2x8x1xf32> to vector<2x8x8xf32>
    %282 = arith.subf %278, %281 : vector<2x8x8xf32>
    %283 = math.exp %282 : vector<2x8x8xf32>
    %cst_74 = arith.constant dense<0.000000e+00> : vector<2x8xf32>
    %284 = vector.multi_reduction <add>, %283, %cst_74 [2] : vector<2x8x8xf32> to vector<2x8xf32>
    %285 = vector.shape_cast %284 : vector<2x8xf32> to vector<2x8x1xf32>
    %286 = tpu.reciprocal %285 {approx = true} : vector<2x8x1xf32> -> vector<2x8x1xf32>
    %287 = vector.broadcast %286 : vector<2x8x1xf32> to vector<2x8x8xf32>
    %288 = arith.mulf %283, %287 : vector<2x8x8xf32>
    %289 = arith.truncf %288 : vector<2x8x8xf32> to vector<2x8x8xbf16>
    "tpu.trace_start"() <{level = 10 : i32, message = "bqk,bkd->bqd"}> : () -> ()
    %cst_75 = arith.constant dense<0.000000e+00> : vector<2x8x16xf32>
    %290 = tpu.matmul %289, %275, %cst_75 {dimension_numbers = #tpu.dot_dimension_numbers<[2], [1], [1], [2], [0, 0, 0, 1, 1, 2], [0], [0]>} : vector<2x8x8xbf16>, vector<2x8x16xbf16>, vector<2x8x16xf32> -> vector<2x8x16xf32>
    "tpu.trace_stop"() : () -> ()
    %291 = vector.shape_cast %290 : vector<2x8x16xf32> to vector<16x16xf32>
    %292 = tpu.concatenate %216, %241, %266, %291 in 1 : vector<16x16xf32>, vector<16x16xf32>, vector<16x16xf32>, vector<16x16xf32> -> vector<16x64xf32>
    %293 = arith.truncf %292 : vector<16x64xf32> to vector<16x64xbf16>
    %c0_76 = arith.constant 0 : index
    %c0_77 = arith.constant 0 : index
    %294 = vector.load %arg9[%c0_76, %c0_77] : memref<64x64xbf16, #tpu.memory_space<vmem>>, vector<64x64xbf16>
    %cst_78 = arith.constant dense<0.000000e+00> : vector<16x64xf32>
    %295 = tpu.matmul %293, %294, %cst_78 {dimension_numbers = #tpu.dot_dimension_numbers<[1], [0], [0], [1], [0, 0, 1, 1], [], []>} : vector<16x64xbf16>, vector<64x64xbf16>, vector<16x64xf32> -> vector<16x64xf32>
    %296 = vector.broadcast %180 : vector<1x64xf32> to vector<16x64xf32>
    %297 = arith.addf %295, %296 : vector<16x64xf32>
    %298 = arith.addf %178, %297 : vector<16x64xf32>
    %cst_79 = arith.constant dense<0.000000e+00> : vector<16xf32>
    %299 = vector.multi_reduction <add>, %298, %cst_79 [1] : vector<16x64xf32> to vector<16xf32>
    %300 = vector.shape_cast %299 : vector<16xf32> to vector<16x1xf32>
    %cst_80 = arith.constant 6.400000e+01 : f32
    %301 = vector.broadcast %cst_80 : f32 to vector<16x1xf32>
    %302 = arith.divf %300, %301 : vector<16x1xf32>
    %303 = vector.broadcast %302 : vector<16x1xf32> to vector<16x64xf32>
    %304 = arith.subf %298, %303 : vector<16x64xf32>
    %305 = arith.mulf %304, %304 : vector<16x64xf32>
    %cst_81 = arith.constant dense<0.000000e+00> : vector<16xf32>
    %306 = vector.multi_reduction <add>, %305, %cst_81 [1] : vector<16x64xf32> to vector<16xf32>
    %307 = vector.shape_cast %306 : vector<16xf32> to vector<16x1xf32>
    %cst_82 = arith.constant 6.400000e+01 : f32
    %308 = vector.broadcast %cst_82 : f32 to vector<16x1xf32>
    %309 = arith.divf %307, %308 : vector<16x1xf32>
    %310 = vector.broadcast %302 : vector<16x1xf32> to vector<16x64xf32>
    %311 = arith.subf %298, %310 : vector<16x64xf32>
    %cst_83 = arith.constant 9.99999974E-6 : f32
    %312 = vector.broadcast %cst_83 : f32 to vector<16x1xf32>
    %313 = arith.addf %309, %312 : vector<16x1xf32>
    %314 = math.rsqrt %313 : vector<16x1xf32>
    %315 = vector.broadcast %314 : vector<16x1xf32> to vector<16x64xf32>
    %316 = arith.mulf %311, %315 : vector<16x64xf32>
    %317 = vector.broadcast %181 : vector<1x64xf32> to vector<16x64xf32>
    %318 = arith.mulf %316, %317 : vector<16x64xf32>
    %319 = vector.broadcast %182 : vector<1x64xf32> to vector<16x64xf32>
    %320 = arith.addf %318, %319 : vector<16x64xf32>
    %321 = arith.truncf %320 : vector<16x64xf32> to vector<16x64xbf16>
    %c0_84 = arith.constant 0 : index
    %c0_85 = arith.constant 0 : index
    %322 = vector.load %arg10[%c0_84, %c0_85] : memref<64x128xbf16, #tpu.memory_space<vmem>>, vector<64x128xbf16>
    %cst_86 = arith.constant dense<0.000000e+00> : vector<16x128xf32>
    %323 = tpu.matmul %321, %322, %cst_86 {dimension_numbers = #tpu.dot_dimension_numbers<[1], [0], [0], [1], [0, 0, 1, 1], [], []>} : vector<16x64xbf16>, vector<64x128xbf16>, vector<16x128xf32> -> vector<16x128xf32>
    %c0_87 = arith.constant 0 : index
    %c0_88 = arith.constant 0 : index
    %324 = vector.load %arg13[%c0_87, %c0_88] : memref<1x128xf32, #tpu.memory_space<vmem>>, vector<1x128xf32>
    %325 = vector.broadcast %324 : vector<1x128xf32> to vector<16x128xf32>
    %326 = arith.addf %323, %325 : vector<16x128xf32>
    %cst_89 = arith.constant 0.000000e+00 : f32
    %327 = vector.broadcast %cst_89 : f32 to vector<16x128xf32>
    %328 = arith.maximumf %326, %327 : vector<16x128xf32>
    %329 = arith.truncf %328 : vector<16x128xf32> to vector<16x128xbf16>
    %c0_90 = arith.constant 0 : index
    %c0_91 = arith.constant 0 : index
    %330 = vector.load %arg11[%c0_90, %c0_91] : memref<128x64xbf16, #tpu.memory_space<vmem>>, vector<128x64xbf16>
    %cst_92 = arith.constant dense<0.000000e+00> : vector<16x64xf32>
    %331 = tpu.matmul %329, %330, %cst_92 {dimension_numbers = #tpu.dot_dimension_numbers<[1], [0], [0], [1], [0, 0, 1, 1], [], []>} : vector<16x128xbf16>, vector<128x64xbf16>, vector<16x64xf32> -> vector<16x64xf32>
    %332 = vector.broadcast %183 : vector<1x64xf32> to vector<16x64xf32>
    %333 = arith.addf %331, %332 : vector<16x64xf32>
    %334 = arith.addf %320, %333 : vector<16x64xf32>
    %cst_93 = arith.constant dense<0.000000e+00> : vector<16xf32>
    %335 = vector.multi_reduction <add>, %334, %cst_93 [1] : vector<16x64xf32> to vector<16xf32>
    %336 = vector.shape_cast %335 : vector<16xf32> to vector<16x1xf32>
    %cst_94 = arith.constant 6.400000e+01 : f32
    %337 = vector.broadcast %cst_94 : f32 to vector<16x1xf32>
    %338 = arith.divf %336, %337 : vector<16x1xf32>
    %339 = vector.broadcast %338 : vector<16x1xf32> to vector<16x64xf32>
    %340 = arith.subf %334, %339 : vector<16x64xf32>
    %341 = arith.mulf %340, %340 : vector<16x64xf32>
    %cst_95 = arith.constant dense<0.000000e+00> : vector<16xf32>
    %342 = vector.multi_reduction <add>, %341, %cst_95 [1] : vector<16x64xf32> to vector<16xf32>
    %343 = vector.shape_cast %342 : vector<16xf32> to vector<16x1xf32>
    %cst_96 = arith.constant 6.400000e+01 : f32
    %344 = vector.broadcast %cst_96 : f32 to vector<16x1xf32>
    %345 = arith.divf %343, %344 : vector<16x1xf32>
    %346 = vector.broadcast %338 : vector<16x1xf32> to vector<16x64xf32>
    %347 = arith.subf %334, %346 : vector<16x64xf32>
    %cst_97 = arith.constant 9.99999974E-6 : f32
    %348 = vector.broadcast %cst_97 : f32 to vector<16x1xf32>
    %349 = arith.addf %345, %348 : vector<16x1xf32>
    %350 = math.rsqrt %349 : vector<16x1xf32>
    %351 = vector.broadcast %350 : vector<16x1xf32> to vector<16x64xf32>
    %352 = arith.mulf %347, %351 : vector<16x64xf32>
    %353 = vector.broadcast %184 : vector<1x64xf32> to vector<16x64xf32>
    %354 = arith.mulf %352, %353 : vector<16x64xf32>
    %355 = vector.broadcast %185 : vector<1x64xf32> to vector<16x64xf32>
    %356 = arith.addf %354, %355 : vector<16x64xf32>
    %357 = arith.truncf %356 : vector<16x64xf32> to vector<16x64xbf16>
    %c0_98 = arith.constant 0 : index
    %c0_99 = arith.constant 0 : index
    %358 = vector.load %arg15[%c0_98, %c0_99] : memref<64x128xbf16, #tpu.memory_space<vmem>>, vector<64x128xbf16>
    %cst_100 = arith.constant dense<0.000000e+00> : vector<16x128xf32>
    %359 = tpu.matmul %357, %358, %cst_100 {dimension_numbers = #tpu.dot_dimension_numbers<[1], [0], [0], [1], [0, 0, 1, 1], [], []>} : vector<16x64xbf16>, vector<64x128xbf16>, vector<16x128xf32> -> vector<16x128xf32>
    %c0_101 = arith.constant 0 : index
    %c0_102 = arith.constant 0 : index
    %360 = vector.load %arg16[%c0_101, %c0_102] : memref<1x128xf32, #tpu.memory_space<vmem>>, vector<1x128xf32>
    %361 = vector.broadcast %360 : vector<1x128xf32> to vector<16x128xf32>
    %362 = arith.addf %359, %361 : vector<16x128xf32>
    %c0_103 = arith.constant 0 : index
    %c0_104 = arith.constant 0 : index
    %363 = vector.load %arg17[%c0_103, %c0_104] : memref<16x128xf32, #tpu.memory_space<vmem>>, vector<16x128xf32>
    tpu.vector_store %arg17[%c0_103, %c0_104], %362 {strides = array<i32>} : memref<16x128xf32, #tpu.memory_space<vmem>>, vector<16x128xf32>,
    return
  }
}

</mosaic_0001>

<bundles_post_ra>
// kernel: transformer_forward.1
= control target key start
LH: loop header
LB: loop body
LE: loop exit
PB: predicated region body
PF: predicated region fallthrough
CT: control target
= control target key end

     0   :  { %s4424_s0 = inlined_call_operand.vmem [shape: f32[16,64], index: 0, kind: input, shape index: {}]   ;;  %s4425_s1 = inlined_call_operand.vmem [shape: bf16[64,192], index: 1, kind: input, shape index: {}]   ;;  %s4426_s2 = inlined_call_operand.vmem [shape: bf16[64,64], index: 2, kind: input, shape index: {}]   ;;  %s4427_s3 = inlined_call_operand.vmem [shape: bf16[64,128], index: 3, kind: input, shape index: {}]   ;;  %s4428_s4 = inlined_call_operand.vmem [shape: bf16[128,64], index: 4, kind: input, shape index: {}]   ;;  %s4429_s5 = inlined_call_operand.vmem [shape: f32[1,192], index: 5, kind: input, shape index: {}]   ;;  %s4430_s6 = inlined_call_operand.vmem [shape: f32[1,128], index: 6, kind: input, shape index: {}]   ;;  %s4431_s7 = inlined_call_operand.vmem [shape: f32[6,64], index: 7, kind: input, shape index: {}]   ;;  %s4432_s8 = inlined_call_operand.vmem [shape: bf16[64,192], index: 8, kind: input, shape index: {}]   ;;  %s4433_s9 = inlined_call_operand.vmem [shape: bf16[64,64], index: 9, kind: input, shape index: {}]   ;;  %s4434_s10 = inlined_call_operand.vmem [shape: bf16[64,128], index: 10, kind: input, shape index: {}]   ;;  %s4435_s11 = inlined_call_operand.vmem [shape: bf16[128,64], index: 11, kind: input, shape index: {}]   ;;  %s4436_s12 = inlined_call_operand.vmem [shape: f32[1,192], index: 12, kind: input, shape index: {}]   ;;  %s4437_s13 = inlined_call_operand.vmem [shape: f32[1,128], index: 13, kind: input, shape index: {}]   ;;  %s4438_s14 = inlined_call_operand.vmem [shape: f32[6,64], index: 14, kind: input, shape index: {}]   ;;  %s4439_s15 = inlined_call_operand.vmem [shape: bf16[64,128], index: 15, kind: input, shape index: {}]   ;;  %s4440_s16 = inlined_call_operand.vmem [shape: f32[1,128], index: 16, kind: input, shape index: {}]   ;;  %s4441_s17 = inlined_call_operand.hbm [shape: f32[16,128], index: 17, kind: output, shape index: {}]  }
   0x1   :  { %4444 = sst [smem:[#allocation5_spill]] %s4424_s0 }
   0x2   :  { %4445 = sst [smem:[#allocation6_spill]] %s4425_s1 }
   0x3   :  { %s4446_s26 = sld [smem:[#allocation6_spill]]  ;;  %v3635_v2 = vmov 0   ;;  %vm122_vm0 = vcmask 523264   ;;  %s4447_s29 = sld [smem:[#allocation5_spill]] }
   0x4   :  { %158 = vmatprep.mubr.bf16.mxu0 %v3635_v2 }
   0x9   :  { %v3471_v0 = vld [vmem:[%s4446_s26 + $0x4] ss:$8 sps:$4 sm:$0xff]   ;;  %v3473_v1 = vld [vmem:[%s4446_s26] ss:$8 sps:$4 sm:$0xff]   ;;  %v3474_v3 = vld [vmem:[%s4446_s26 + $0x14] ss:$8 sps:$4 sm:$0xff]  }
   0xa   :  { %126 = vmatprep.subr.bf16.mxu0 %v3471_v0  ;;  %v3476_v4 = vld [vmem:[%s4446_s26 + $0x10] ss:$8 sps:$4 sm:$0xff]   ;;  %v3477_v5 = vld [vmem:[%s4446_s26 + $0x24] ss:$8 sps:$4 sm:$0xff]   ;;  %v3479_v6 = vld [vmem:[%s4446_s26 + $0x20] ss:$8 sps:$4 sm:$0xff]  }
   0xb   :  { %127 = vmatpush1.bf16.msra.mxu0 %v3473_v1  ;;  %v3480_v7 = vld [vmem:[%s4446_s26 + $0x34] ss:$8 sps:$4 sm:$0xff]   ;;  %v3482_v8 = vld [vmem:[%s4446_s26 + $0x30] ss:$8 sps:$4 sm:$0xff]   ;;  %v3766_v9 = vld [vmem:[%s4447_s29] sm:$0xff] }
   0xc   :  { %128 = vmatprep.subr.bf16.mxu0 %v3474_v3  ;;  %v3771_v10 = vld [vmem:[%s4447_s29 + $0x8] sm:$0xff] }
   0xd   :  { %v61_v11 = vpack.c.bf16 %v3771_v10, %v3766_v9 }
   0xf   :  { %129 = vmatpush1.bf16.msra.mxu0 %v3476_v4 }
  0x10   :  { %130 = vmatprep.subr.bf16.mxu0 %v3477_v5 }
  0x13   :  { %131 = vmatpush1.bf16.msra.mxu0 %v3479_v6 }
  0x14   :  { %132 = vmatprep.subr.bf16.mxu0 %v3480_v7 }
  0x17   :  { %133 = vmatpush1.bf16.msra.mxu0 %v3482_v8 }
  0x1a   :  { %2943 = vmatmul.mubr.msk.bf16.vlgmr.msra.gmra.mrb[0].mxu0 %vm122_vm0, %v61_v11 }
  0x1b   :  { %22 = vsyncpa [#allocation3], 0  ;;  %v72_v12 = vlaneseq  ;;  %v3636_v14 = vmov 0.0   ;;  %v70_v16 = vld [vmem:[%s4429_s5] sm:$0x3]  ;;  %vm3637_vm1 = vmmov 0  }
  0x1c   :  { %3136 = vmatprep.subr.bf16.mxu1 %v3636_v14  ;;  %3160 = vmatprep.subr.bf16.mxu0 %v3636_v14  ;;  %s3638_s5 = smov 64   ;;  %vm176_vm2 = vcmask 130048   ;;  %vm302_vm3 = vcmask 1043456   ;;  %vm274_vm4 = vcmask 64512   ;;  %s3639_s19 = smov 48   ;;  %vm1086_vm5 = vcmask 261120  }
  0x1d   :  { %v3776_v13 = vshrl.u32 %v72_v12, 7  ;;  %3138 = vmatprep.mubr.msk.bf16.mxu1 %vm3637_vm1, %v3636_v14  ;;  %3162 = vmatprep.mubr.msk.bf16.mxu0 %vm3637_vm1, %v3636_v14  ;;  %s3640_s1 = smov 112   ;;  %s3641_s20 = smov 32   ;;  %vm1089_vm6 = vcmask 392192  }
  0x1e   :  { %s3642_s21 = smov 96   ;;  %s3643_s22 = smov 16  }
  0x1f   :  { %v3781_v15 = vsub.s32 0, %v3776_v13  ;;  %v3792_v18 = vsub.s32 1, %v3776_v13  ;;  %s3644_s23 = smov 80   ;;  %s3645_s18 = smov [#allocation2]  }
  0x21   :  { %v75_v17 = vrot.slane %v70_v16, %v3781_v15  ;;  %v79_v22 = vrot.slane %v70_v16, %v3792_v18 }
  0xed   :  { %v160_v19 = vpop.f32.mrb[0].mxu0 }
  0xee   :  { %v161_v20 = vadd.f32 %v160_v19, %v75_v17  ;;  %v162_v21 = vpop.f32.mrb[1].mxu0 }
  0xef   :  { %v164_v23 = vpop.f32.mrb[2].mxu0  ;;  %v163_v32 = vadd.f32 %v162_v21, %v79_v22 }
  0xf0   :  { %v3795_v24 = vpack.c.bf16 %v161_v20, %v161_v20  ;;  %v165_v25 = vadd.f32 %v164_v23, %v75_v17  ;;  %v166_v26 = vpop.f32.mrb[3].mxu0 }
  0xf1   :  { %v3797_v27 = vadd.f32 %v166_v26, %v79_v22  ;;  %v3813_v34 = vpack.c.bf16 %v163_v32, %v163_v32 }
  0xf2   :  { %174 = vrot.lane.b32.xlu0 %v3795_v24, %s3638_s5  ;;  %v3801_v28 = vpack.c.bf16 %v165_v25, %v165_v25 }
  0xf3   :  { %v304_v35 = vsel %vm302_vm3, %v3813_v34, 0  ;;  %v3838_v0 = vpack.c.bf16 %v3797_v27, %v3797_v27 }
  0xf5   :  { %v350_v5 = vsel %vm302_vm3, %v3838_v0, 0 }
  0xf6   :  { %224 = vrot.lane.b32.xlu0 %v3801_v28, %s3638_s5 }
 0x164   :  { %v175_v29 = vpop.permute.xlu0 %174 }
 0x165   :  { %v181_v30 = vsel %vm176_vm2, %v175_v29, 0 }
 0x166   :  { %3137 = vmatpush3.bf16.xpose.msra.mxu1 %v181_v30 }
 0x167   :  { %3142 = vmatprep.subr.bf16.mxu1 %v3636_v14 }
 0x168   :  { %v225_v31 = vpop.permute.xlu0 %224 }
 0x169   :  { %v230_v33 = vsel %vm176_vm2, %v225_v31, 0 }
 0x16d   :  { %3139 = vmatmul.mubr.msk.bf16.vlgmr.msra.gmra.mrb[0].mxu1 %vm176_vm2, %v3795_v24 }
 0x16e   :  { %3143 = vmatpush3.bf16.xpose.msra.mxu1 %v230_v33  ;;  %3144 = vmatprep.mubr.msk.bf16.mxu1 %vm3637_vm1, %v3636_v14 }
 0x16f   :  { %3148 = vmatprep.subr.bf16.mxu1 %v3636_v14 }
 0x175   :  { %3145 = vmatmul.mubr.msk.bf16.vlgmr.msra.gmra.mrb[4].mxu1 %vm176_vm2, %v3801_v28 }
 0x176   :  { %3149 = vmatpush3.bf16.msra.mxu1 %v304_v35  ;;  %3150 = vmatprep.mubr.msk.bf16.mxu1 %vm3637_vm1, %v3636_v14 }
 0x177   :  { %3154 = vmatprep.subr.bf16.mxu1 %v3636_v14 }
 0x240   :  { %v217_v36 = vpop.f32.mrb[0].mxu1 }
 0x241   :  { %v272_v37 = vmul.f32 0.25, %v217_v36  ;;  %v3140_v38 = vpop.f32.mrb[1].mxu1 }
 0x242   :  { %v220_v39 = vpop.f32.mrb[2].mxu1 }
 0x243   :  { %v3141_v40 = vpop.f32.mrb[3].mxu1  ;;  %v275_v41 = vsel %vm274_vm4, %v272_v37, -inf }
 0x244   :  { %276 = vmax.xlane.f32.xlu1 %v275_v41 }
 0x248   :  { %v266_v42 = vpop.f32.mrb[4].mxu1 }
 0x249   :  { %v273_v43 = vmul.f32 0.25, %v266_v42  ;;  %v3146_v44 = vpop.f32.mrb[5].mxu1 }
 0x24a   :  { %v269_v45 = vpop.f32.mrb[6].mxu1 }
 0x24b   :  { %v3147_v46 = vpop.f32.mrb[7].mxu1  ;;  %v278_v47 = vsel %vm274_vm4, %v273_v43, -inf }
 0x24c   :  { %279 = vmax.xlane.f32.xlu1 %v278_v47 }
 0x25d   :  { %394 = vrot.lane.b32.xlu1 %v3795_v24, %s3639_s19 }
 0x261   :  { %444 = vrot.lane.b32.xlu1 %v3801_v28, %s3639_s19 }
 0x2d1   :  { %v277_v48 = vpop.xlane.xlu1 %276 }
 0x2d2   :  { %v281_v49 = vsub.f32 %v272_v37, %v277_v48 }
 0x2d4   :  { %v283_v50 = vmul.f32 1.442695, %v281_v49 }
 0x2d6   :  { %3531 = vpow2.f32 %v283_v50 }
 0x2d9   :  { %v280_v51 = vpop.xlane.xlu1 %279 }
 0x2da   :  { %v282_v52 = vsub.f32 %v273_v43, %v280_v51 }
 0x2dc   :  { %v285_v53 = vmul.f32 1.442695, %v282_v52 }
 0x2dd   :  { %v395_v54 = vpop.permute.xlu1 %394 }
 0x2de   :  { %3533 = vpow2.f32 %v285_v53  ;;  %v400_v55 = vsel %vm176_vm2, %v395_v54, 0 }
 0x2df   :  { %3161 = vmatpush3.bf16.xpose.msra.mxu0 %v400_v55 }
 0x2e0   :  { %v3532_v56 = vpop.eup %3531  ;;  %3172 = vmatprep.subr.bf16.mxu0 %v3636_v14 }
 0x2e1   :  { %v287_v57 = vsel %vm274_vm4, %v3532_v56, 0.0  ;;  %v445_v61 = vpop.permute.xlu1 %444 }
 0x2e2   :  { %288 = vadd.xlane.f32.xlu0 %v287_v57  ;;  %v450_v11 = vsel %vm176_vm2, %v445_v61, 0 }
 0x2e8   :  { %v3534_v58 = vpop.eup %3533 }
 0x2e9   :  { %v290_v59 = vsel %vm274_vm4, %v3534_v58, 0.0 }
 0x2ea   :  { %291 = vadd.xlane.f32.xlu1 %v290_v59 }
 0x2fb   :  { %392 = vrot.lane.b32.xlu1 %v3795_v24, %s3640_s1 }
 0x2ff   :  { %442 = vrot.lane.b32.xlu1 %v3801_v28, %s3640_s1 }
 0x36f   :  { %v289_v60 = vpop.xlane.xlu0 %288 }
 0x370   :  { %3535 = vrcp.f32 %v289_v60 }
 0x377   :  { %v292_v62 = vpop.xlane.xlu1 %291 }
 0x378   :  { %3537 = vrcp.f32 %v292_v62 }
 0x37a   :  { %v3536_v63 = vpop.eup %3535 }
 0x37b   :  { %v295_v1 = vmul.f32 %v3536_v63, %v3532_v56  ;;  %v393_v3 = vpop.permute.xlu1 %392 }
 0x37c   :  { %3163 = vmatmul.mubr.msk.bf16.vlgmr.msra.gmra.mrb[4].mxu0 %vm176_vm2, %v393_v3 }
 0x37d   :  { %v297_v4 = vpack.c.bf16 %v295_v1, %v295_v1  ;;  %3174 = vmatprep.mubr.msk.bf16.mxu0 %vm3637_vm1, %v3636_v14 }
 0x37f   :  { %3151 = vmatmul.mubr.msk.bf16.vlgmr.msra.gmra.mrb[8].mxu1 %vm274_vm4, %v297_v4  ;;  %v443_v12 = vpop.permute.xlu1 %442 }
 0x380   :  { %3155 = vmatpush3.bf16.msra.mxu1 %v350_v5  ;;  %3156 = vmatprep.mubr.msk.bf16.mxu1 %vm3637_vm1, %v3636_v14 }
 0x381   :  { %3166 = vmatprep.subr.bf16.mxu1 %v3636_v14 }
 0x382   :  { %v3538_v6 = vpop.eup %3537 }
 0x383   :  { %v296_v7 = vmul.f32 %v3538_v6, %v3534_v58 }
 0x385   :  { %v298_v8 = vpack.c.bf16 %v296_v7, %v296_v7 }
 0x387   :  { %3157 = vmatmul.mubr.msk.bf16.vlgmr.msra.gmra.mrb[12].mxu1 %vm274_vm4, %v298_v8 }
 0x388   :  { %3168 = vmatprep.mubr.msk.bf16.mxu1 %vm3637_vm1, %v3636_v14 }
 0x389   :  { %3167 = vmatpush3.bf16.xpose.msra.mxu1 %v450_v11 }
 0x38a   :  { %3178 = vmatprep.subr.bf16.mxu1 %v3636_v14 }
 0x390   :  { %3169 = vmatmul.mubr.msk.bf16.vlgmr.msra.gmra.mrb[16].mxu1 %vm176_vm2, %v443_v12 }
 0x391   :  { %3180 = vmatprep.mubr.msk.bf16.mxu1 %vm3637_vm1, %v3636_v14 }
 0x44f   :  { %v436_v16 = vpop.f32.mrb[4].mxu0 }
 0x450   :  { %v492_v17 = vmul.f32 0.25, %v436_v16  ;;  %v3164_v19 = vpop.f32.mrb[5].mxu0 }
 0x451   :  { %v439_v20 = vpop.f32.mrb[6].mxu0 }
 0x452   :  { %v3857_v21 = vpop.f32.mrb[8].mxu1  ;;  %v3165_v22 = vpop.f32.mrb[7].mxu0  ;;  %v494_v23 = vsel %vm274_vm4, %v492_v17, -inf }
 0x453   :  { %495 = vmax.xlane.f32.xlu0 %v494_v23  ;;  %v3152_v25 = vpop.f32.mrb[9].mxu1 }
 0x454   :  { %v343_v26 = vpop.f32.mrb[10].mxu1 }
 0x455   :  { %v3153_v27 = vpop.f32.mrb[11].mxu1 }
 0x45a   :  { %v3860_v29 = vpop.f32.mrb[12].mxu1 }
 0x45b   :  { %v3158_v30 = vpop.f32.mrb[13].mxu1 }
 0x45c   :  { %v389_v31 = vpop.f32.mrb[14].mxu1 }
 0x45d   :  { %v3159_v32 = vpop.f32.mrb[15].mxu1 }
 0x463   :  { %v486_v33 = vpop.f32.mrb[16].mxu1 }
 0x464   :  { %v493_v35 = vmul.f32 0.25, %v486_v33  ;;  %v3170_v36 = vpop.f32.mrb[17].mxu1 }
 0x465   :  { %v489_v37 = vpop.f32.mrb[18].mxu1 }
 0x466   :  { %v3171_v38 = vpop.f32.mrb[19].mxu1  ;;  %v497_v39 = vsel %vm274_vm4, %v493_v35, -inf }
 0x467   :  { %498 = vmax.xlane.f32.xlu1 %v497_v39 }
 0x478   :  { %668 = vrot.lane.b32.xlu1 %v3801_v28, %s3641_s20 }
 0x4e0   :  { %v496_v40 = vpop.xlane.xlu0 %495 }
 0x4e1   :  { %v500_v41 = vsub.f32 %v492_v17, %v496_v40 }
 0x4e3   :  { %v502_v42 = vmul.f32 1.442695, %v500_v41 }
 0x4e5   :  { %3539 = vpow2.f32 %v502_v42 }
 0x4ef   :  { %v3540_v43 = vpop.eup %3539 }
 0x4f0   :  { %v506_v44 = vsel %vm274_vm4, %v3540_v43, 0.0 }
 0x4f1   :  { %507 = vadd.xlane.f32.xlu0 %v506_v44 }
 0x4f4   :  { %v499_v45 = vpop.xlane.xlu1 %498 }
 0x4f5   :  { %v501_v46 = vsub.f32 %v493_v35, %v499_v45 }
 0x4f7   :  { %v504_v47 = vmul.f32 1.442695, %v501_v46 }
 0x4f8   :  { %v669_v1 = vpop.permute.xlu1 %668 }
 0x4f9   :  { %3541 = vpow2.f32 %v504_v47  ;;  %v674_v4 = vsel %vm176_vm2, %v669_v1, 0 }
 0x503   :  { %v3542_v48 = vpop.eup %3541 }
 0x504   :  { %v509_v49 = vsel %vm274_vm4, %v3542_v48, 0.0 }
 0x507   :  { %519 = vrot.lane.b32.xlu0 %v3813_v34, %s3640_s1 }
 0x50b   :  { %568 = vrot.lane.b32.xlu0 %v3838_v0, %s3640_s1 }
 0x52a   :  { %510 = vadd.xlane.f32.xlu0 %v509_v49 }
 0x540   :  { %618 = vrot.lane.b32.xlu0 %v3795_v24, %s3641_s20 }
 0x544   :  { %616 = vrot.lane.b32.xlu0 %v3795_v24, %s3642_s21 }
 0x548   :  { %666 = vrot.lane.b32.xlu0 %v3801_v28, %s3642_s21 }
 0x57e   :  { %v508_v50 = vpop.xlane.xlu0 %507 }
 0x57f   :  { %3543 = vrcp.f32 %v508_v50 }
 0x582   :  { %v520_v51 = vpop.permute.xlu0 %519 }
 0x583   :  { %v525_v52 = vsel %vm302_vm3, %v520_v51, 0 }
 0x584   :  { %3173 = vmatpush3.bf16.msra.mxu0 %v525_v52 }
 0x585   :  { %3184 = vmatprep.subr.bf16.mxu0 %v3636_v14 }
 0x586   :  { %v569_v53 = vpop.permute.xlu0 %568 }
 0x587   :  { %v574_v54 = vsel %vm302_vm3, %v569_v53, 0 }
 0x588   :  { %3179 = vmatpush3.bf16.msra.mxu1 %v574_v54 }
 0x589   :  { %v3544_v55 = vpop.eup %3543  ;;  %3190 = vmatprep.subr.bf16.mxu1 %v3636_v14 }
 0x58a   :  { %v514_v56 = vmul.f32 %v3544_v55, %v3540_v43 }
 0x58c   :  { %v516_v57 = vpack.c.bf16 %v514_v56, %v514_v56 }
 0x58e   :  { %3175 = vmatmul.mubr.msk.bf16.vlgmr.msra.gmra.mrb[8].mxu0 %vm274_vm4, %v516_v57 }
 0x58f   :  { %3186 = vmatprep.mubr.msk.bf16.mxu0 %vm3637_vm1, %v3636_v14 }
 0x5b7   :  { %v511_v58 = vpop.xlane.xlu0 %510 }
 0x5b8   :  { %3545 = vrcp.f32 %v511_v58 }
 0x5bb   :  { %v619_v59 = vpop.permute.xlu0 %618 }
 0x5bc   :  { %v624_v60 = vsel %vm176_vm2, %v619_v59, 0 }
 0x5bd   :  { %3185 = vmatpush3.bf16.xpose.msra.mxu0 %v624_v60 }
 0x5be   :  { %3196 = vmatprep.subr.bf16.mxu0 %v3636_v14 }
 0x5bf   :  { %v617_v63 = vpop.permute.xlu0 %616 }
 0x5c2   :  { %v3546_v61 = vpop.eup %3545 }
 0x5c3   :  { %v515_v62 = vmul.f32 %v3546_v61, %v3542_v48  ;;  %v667_v5 = vpop.permute.xlu0 %666 }
 0x5c4   :  { %3187 = vmatmul.mubr.msk.bf16.vlgmr.msra.gmra.mrb[12].mxu0 %vm176_vm2, %v617_v63 }
 0x5c5   :  { %v517_v3 = vpack.c.bf16 %v515_v62, %v515_v62  ;;  %3198 = vmatprep.mubr.msk.bf16.mxu0 %vm3637_vm1, %v3636_v14 }
 0x5c7   :  { %3181 = vmatmul.mubr.msk.bf16.vlgmr.msra.gmra.mrb[20].mxu1 %vm274_vm4, %v517_v3 }
 0x5c8   :  { %3191 = vmatpush3.bf16.xpose.msra.mxu1 %v674_v4  ;;  %3192 = vmatprep.mubr.msk.bf16.mxu1 %vm3637_vm1, %v3636_v14 }
 0x5c9   :  { %3202 = vmatprep.subr.bf16.mxu1 %v3636_v14 }
 0x5cf   :  { %3193 = vmatmul.mubr.msk.bf16.vlgmr.msra.gmra.mrb[24].mxu1 %vm176_vm2, %v667_v5 }
 0x5d0   :  { %3204 = vmatprep.mubr.msk.bf16.mxu1 %vm3637_vm1, %v3636_v14 }
 0x661   :  { %v3897_v6 = vpop.f32.mrb[8].mxu0 }
 0x662   :  { %v3176_v7 = vpop.f32.mrb[9].mxu0 }
 0x663   :  { %v564_v8 = vpop.f32.mrb[10].mxu0 }
 0x664   :  { %v3177_v11 = vpop.f32.mrb[11].mxu0 }
 0x697   :  { %v660_v12 = vpop.f32.mrb[12].mxu0 }
 0x698   :  { %v716_v16 = vmul.f32 0.25, %v660_v12  ;;  %v3188_v17 = vpop.f32.mrb[13].mxu0 }
 0x699   :  { %v663_v19 = vpop.f32.mrb[14].mxu0 }
 0x69a   :  { %v3899_v20 = vpop.f32.mrb[20].mxu1  ;;  %v3189_v22 = vpop.f32.mrb[15].mxu0  ;;  %v718_v23 = vsel %vm274_vm4, %v716_v16, -inf }
 0x69b   :  { %v3441_v25 = vpack.i.bf16 %v3899_v20, %v3897_v6  ;;  %v3182_v26 = vpop.f32.mrb[21].mxu1  ;;  %719 = vmax.xlane.f32.xlu0 %v718_v23 }
 0x69c   :  { %v613_v27 = vpop.f32.mrb[22].mxu1 }
 0x69d   :  { %v3183_v30 = vpop.f32.mrb[23].mxu1 }
 0x6a2   :  { %v710_v31 = vpop.f32.mrb[24].mxu1 }
 0x6a3   :  { %v717_v32 = vmul.f32 0.25, %v710_v31  ;;  %v3194_v33 = vpop.f32.mrb[25].mxu1 }
 0x6a4   :  { %v713_v35 = vpop.f32.mrb[26].mxu1 }
 0x6a5   :  { %v3195_v36 = vpop.f32.mrb[27].mxu1  ;;  %v721_v37 = vsel %vm274_vm4, %v717_v32, -inf }
 0x6a6   :  { %722 = vmax.xlane.f32.xlu1 %v721_v37 }
 0x6b7   :  { %790 = vrot.lane.b32.xlu1 %v3838_v0, %s3642_s21 }
 0x6bb   :  { %840 = vrot.lane.b32.xlu1 %v3795_v24, %s3643_s22 }
 0x6bf   :  { %838 = vrot.lane.b32.xlu1 %v3795_v24, %s3644_s23 }
 0x728   :  { %v720_v38 = vpop.xlane.xlu0 %719 }
 0x729   :  { %v724_v39 = vsub.f32 %v716_v16, %v720_v38 }
 0x72b   :  { %v726_v40 = vmul.f32 1.442695, %v724_v39 }
 0x72d   :  { %3547 = vpow2.f32 %v726_v40 }
 0x733   :  { %v723_v41 = vpop.xlane.xlu1 %722 }
 0x734   :  { %v725_v46 = vsub.f32 %v717_v32, %v723_v41 }
 0x736   :  { %v728_v24 = vmul.f32 1.442695, %v725_v46 }
 0x737   :  { %v3548_v42 = vpop.eup %3547  ;;  %v791_v43 = vpop.permute.xlu1 %790 }
 0x738   :  { %v796_v44 = vsel %vm302_vm3, %v791_v43, 0  ;;  %v730_v45 = vsel %vm274_vm4, %v3548_v42, 0.0  ;;  %3549 = vpow2.f32 %v728_v24 }
 0x739   :  { %3203 = vmatpush3.bf16.msra.mxu1 %v796_v44  ;;  %731 = vadd.xlane.f32.xlu0 %v730_v45 }
 0x73a   :  { %3214 = vmatprep.subr.bf16.mxu1 %v3636_v14 }
 0x73b   :  { %v841_v54 = vpop.permute.xlu1 %840 }
 0x73c   :  { %v846_v56 = vsel %vm176_vm2, %v841_v54, 0  ;;  %v3484_v54 = vld [vmem:[%s4426_s2 + $0x8] sm:$0xff]  }
 0x742   :  { %v3550_v47 = vpop.eup %3549 }
 0x743   :  { %v733_v48 = vsel %vm274_vm4, %v3550_v47, 0.0 }
 0x74f   :  { %742 = vrot.lane.b32.xlu0 %v3813_v34, %s3642_s21 }
 0x76e   :  { %734 = vadd.xlane.f32.xlu0 %v733_v48 }
 0x784   :  { %890 = vrot.lane.b32.xlu0 %v3801_v28, %s3643_s22 }
 0x788   :  { %888 = vrot.lane.b32.xlu0 %v3801_v28, %s3644_s23  ;;  %v839_v28 = vpop.permute.xlu1 %838 }
 0x7c6   :  { %v732_v49 = vpop.xlane.xlu0 %731 }
 0x7c7   :  { %3551 = vrcp.f32 %v732_v49 }
 0x7ca   :  { %v743_v50 = vpop.permute.xlu0 %742 }
 0x7cb   :  { %v748_v51 = vsel %vm302_vm3, %v743_v50, 0 }
 0x7cc   :  { %3197 = vmatpush3.bf16.msra.mxu0 %v748_v51 }
 0x7cd   :  { %3208 = vmatprep.subr.bf16.mxu0 %v3636_v14 }
 0x7d1   :  { %v3552_v52 = vpop.eup %3551 }
 0x7d2   :  { %v738_v53 = vmul.f32 %v3552_v52, %v3548_v42 }
 0x7d4   :  { %v740_v55 = vpack.c.bf16 %v738_v53, %v738_v53  ;;  %v3483_v53 = vld [vmem:[%s4426_s2] sm:$0xff]  }
 0x7d6   :  { %3199 = vmatmul.mubr.msk.bf16.vlgmr.msra.gmra.mrb[16].mxu0 %vm274_vm4, %v740_v55  ;;  %v3485_v55 = vld [vmem:[%s4426_s2 + $0x10] sm:$0xff]  }
 0x7d7   :  { %3209 = vmatpush3.bf16.xpose.msra.mxu0 %v846_v56  ;;  %3210 = vmatprep.mubr.msk.bf16.mxu0 %vm3637_vm1, %v3636_v14 }
 0x7d8   :  { %3220 = vmatprep.subr.bf16.mxu0 %v3636_v14 }
 0x7de   :  { %3211 = vmatmul.mubr.msk.bf16.vlgmr.msra.gmra.mrb[20].mxu0 %vm176_vm2, %v839_v28 }
 0x7df   :  { %3222 = vmatprep.mubr.msk.bf16.mxu0 %vm3637_vm1, %v3636_v14 }
 0x7fb   :  { %v735_v57 = vpop.xlane.xlu0 %734 }
 0x7fc   :  { %3553 = vrcp.f32 %v735_v57 }
 0x7ff   :  { %v891_v60 = vpop.permute.xlu0 %890 }
 0x800   :  { %v896_v62 = vsel %vm176_vm2, %v891_v60, 0 }
 0x803   :  { %v889_v63 = vpop.permute.xlu0 %888 }
 0x806   :  { %v3554_v58 = vpop.eup %3553 }
 0x807   :  { %v739_v59 = vmul.f32 %v3554_v58, %v3550_v47 }
 0x809   :  { %v741_v61 = vpack.c.bf16 %v739_v59, %v739_v59  ;;  %v3486_v59 = vld [vmem:[%s4426_s2 + $0x18] sm:$0xff]  }
 0x80b   :  { %3205 = vmatmul.mubr.msk.bf16.vlgmr.msra.gmra.mrb[28].mxu1 %vm274_vm4, %v741_v61 }
 0x80c   :  { %3215 = vmatpush3.bf16.xpose.msra.mxu1 %v896_v62  ;;  %3216 = vmatprep.mubr.msk.bf16.mxu1 %vm3637_vm1, %v3636_v14 }
 0x80d   :  { %3226 = vmatprep.subr.bf16.mxu1 %v3636_v14 }
 0x813   :  { %3217 = vmatmul.mubr.msk.bf16.vlgmr.msra.gmra.mrb[32].mxu1 %vm176_vm2, %v889_v63 }
 0x814   :  { %3228 = vmatprep.mubr.msk.bf16.mxu1 %vm3637_vm1, %v3636_v14 }
 0x8a9   :  { %v784_v1 = vpop.f32.mrb[16].mxu0 }
 0x8aa   :  { %v3200_v3 = vpop.f32.mrb[17].mxu0 }
 0x8ab   :  { %v787_v4 = vpop.f32.mrb[18].mxu0 }
 0x8ac   :  { %v3201_v5 = vpop.f32.mrb[19].mxu0 }
 0x8b1   :  { %v882_v7 = vpop.f32.mrb[20].mxu0 }
 0x8b2   :  { %v938_v8 = vmul.f32 0.25, %v882_v7  ;;  %v3212_v11 = vpop.f32.mrb[21].mxu0 }
 0x8b3   :  { %v885_v12 = vpop.f32.mrb[22].mxu0 }
 0x8b4   :  { %v3213_v16 = vpop.f32.mrb[23].mxu0  ;;  %v940_v17 = vsel %vm274_vm4, %v938_v8, -inf }
 0x8b5   :  { %941 = vmax.xlane.f32.xlu1 %v940_v17 }
 0x8de   :  { %v832_v19 = vpop.f32.mrb[28].mxu1 }
 0x8df   :  { %v3446_v22 = vpack.i.bf16 %v832_v19, %v784_v1  ;;  %v3206_v23 = vpop.f32.mrb[29].mxu1 }
 0x8e0   :  { %v835_v26 = vpop.f32.mrb[30].mxu1 }
 0x8e1   :  { %v3207_v27 = vpop.f32.mrb[31].mxu1 }
 0x8e6   :  { %v932_v30 = vpop.f32.mrb[32].mxu1 }
 0x8e7   :  { %v939_v31 = vmul.f32 0.25, %v932_v30  ;;  %v3218_v32 = vpop.f32.mrb[33].mxu1 }
 0x8e8   :  { %v935_v33 = vpop.f32.mrb[34].mxu1 }
 0x8e9   :  { %v3219_v35 = vpop.f32.mrb[35].mxu1  ;;  %v943_v36 = vsel %vm274_vm4, %v939_v31, -inf }
 0x8ea   :  { %944 = vmax.xlane.f32.xlu0 %v943_v36 }
 0x942   :  { %v942_v37 = vpop.xlane.xlu1 %941 }
 0x943   :  { %v946_v38 = vsub.f32 %v938_v8, %v942_v37 }
 0x945   :  { %v948_v39 = vmul.f32 1.442695, %v946_v38 }
 0x947   :  { %3555 = vpow2.f32 %v948_v39 }
 0x951   :  { %v3556_v40 = vpop.eup %3555 }
 0x952   :  { %v952_v41 = vsel %vm274_vm4, %v3556_v40, 0.0 }
 0x953   :  { %953 = vadd.xlane.f32.xlu0 %v952_v41 }
 0x969   :  { %964 = vrot.lane.b32.xlu0 %v3813_v34, %s3644_s23 }
 0x96d   :  { %3447 = vrot.lane.b32.xlu0 %v3446_v22, %s3641_s20 }
 0x977   :  { %v945_v42 = vpop.xlane.xlu0 %944 }
 0x978   :  { %v947_v43 = vsub.f32 %v939_v31, %v945_v42 }
 0x97a   :  { %v950_v44 = vmul.f32 1.442695, %v947_v43 }
 0x97c   :  { %3557 = vpow2.f32 %v950_v44 }
 0x986   :  { %v3558_v45 = vpop.eup %3557 }
 0x987   :  { %v955_v46 = vsel %vm274_vm4, %v3558_v45, 0.0 }
 0x988   :  { %956 = vadd.xlane.f32.xlu1 %v955_v46 }
 0x999   :  { %1012 = vrot.lane.b32.xlu1 %v3838_v0, %s3644_s23 }
 0x99d   :  { %3442 = vrot.lane.b32.xlu1 %v3441_v25, %s3643_s22 }
 0x9e0   :  { %v954_v24 = vpop.xlane.xlu0 %953 }
 0x9e1   :  { %3559 = vrcp.f32 %v954_v24 }
 0x9e4   :  { %v965_v34 = vpop.permute.xlu0 %964 }
 0x9e5   :  { %v970_v47 = vsel %vm302_vm3, %v965_v34, 0 }
 0x9e6   :  { %3221 = vmatpush3.bf16.msra.mxu0 %v970_v47 }
 0x9e7   :  { %3232 = vmatprep.subr.bf16.mxu0 %v3636_v14 }
 0x9e8   :  { %v3448_v7 = vpop.permute.xlu0 %3447 }
 0x9e9   :  { %v3450_v12 = vunpack.i.h.bf16 %v3448_v7  ;;  %v3449_v16 = vunpack.i.l.bf16 %v3448_v7 }
 0x9eb   :  { %v3560_v48 = vpop.eup %3559 }
 0x9ec   :  { %v960_v49 = vmul.f32 %v3560_v48, %v3556_v40 }
 0x9ee   :  { %v962_v50 = vpack.c.bf16 %v960_v49, %v960_v49 }
 0x9f0   :  { %3223 = vmatmul.mubr.msk.bf16.vlgmr.msra.gmra.mrb[24].mxu0 %vm274_vm4, %v962_v50  ;;  %v3488_v50 = vld [vmem:[%s4427_s3 + $0x8] sm:$0xff]  }
 0x9f1   :  { %3240 = vmatprep.mubr.msk.bf16.mxu0 %vm3637_vm1, %v3636_v14  ;;  %3233 = vmatpush3.bf16.msra.mxu0 %v3483_v53  ;;  %v3495_v53 = vld [vmem:[%s4428_s4 + $0x20] sm:$0xff]  }
 0x9f2   :  { %3234 = vmatprep.subr.bf16.mxu0 %v3636_v14 }
 0x9f5   :  { %3235 = vmatpush3.bf16.msra.mxu0 %v3484_v54  ;;  %v3496_v54 = vld [vmem:[%s4428_s4 + $0x28] sm:$0xff]  }
 0x9f6   :  { %3236 = vmatprep.subr.bf16.mxu0 %v3636_v14 }
 0x9f9   :  { %3237 = vmatpush3.bf16.msra.mxu0 %v3485_v55 }
 0x9fa   :  { %3238 = vmatprep.subr.bf16.mxu0 %v3636_v14 }
 0x9fd   :  { %3239 = vmatpush3.bf16.msra.mxu0 %v3486_v59 }
 0x9fe   :  { %3256 = vmatprep.subr.bf16.mxu0 %v3636_v14 }
 0xa15   :  { %v957_v0 = vpop.xlane.xlu1 %956 }
 0xa16   :  { %3561 = vrcp.f32 %v957_v0  ;;  %v3489_v0 = vld [vmem:[%s4427_s3 + $0x10] sm:$0xff]  }
 0xa19   :  { %v1013_v6 = vpop.permute.xlu1 %1012 }
 0xa1a   :  { %v1018_v20 = vsel %vm302_vm3, %v1013_v6, 0  ;;  %v3490_v6 = vld [vmem:[%s4427_s3 + $0x18] sm:$0xff]  }
 0xa1b   :  { %3227 = vmatpush3.bf16.msra.mxu1 %v1018_v20  ;;  %v3491_v20 = vld [vmem:[%s4428_s4] sm:$0xff]  }
 0xa1c   :  { %3244 = vmatprep.subr.bf16.mxu1 %v3636_v14 }
 0xa1d   :  { %v3443_v3 = vpop.permute.xlu1 %3442 }
 0xa1e   :  { %v3445_v4 = vunpack.i.h.bf16 %v3443_v3  ;;  %v3444_v5 = vunpack.i.l.bf16 %v3443_v3 }
 0xa20   :  { %v3562_v25 = vpop.eup %3561  ;;  %v1085_v8 = vsel %vm176_vm2, %v3860_v29, %v3445_v4  ;;  %v1084_v11 = vsel %vm176_vm2, %v3857_v21, %v3444_v5  ;;  %v3993_v21 = vld [vmem:[%s4431_s7] sm:$0x3f]  ;;  %s2924_s7 = sshll.u32 %s3645_s18, 4  ;;  %s2925_s7 = int_to_ptr.vmem [resolvable:$true] %s2924_s7 }
 0xa21   :  { %v961_v51 = vmul.f32 %v3562_v25, %v3558_v45  ;;  %v1087_v23 = vsel %vm1086_vm5, %v1084_v11, %v3449_v16  ;;  %v1088_v26 = vsel %vm1086_vm5, %v1085_v8, %v3450_v12  ;;  %v1104_v29 = vrot.slane %v3993_v21, %v3781_v15  ;;  %v3492_v25 = vld [vmem:[%s4428_s4 + $0x8] sm:$0xff]   ;;  %v3497_v16 = vld [vmem:[%s4428_s4 + $0x30] sm:$0xff]   ;;  %s3611_s24 = scalar_lea.vmem %s2925_s7, 256  ;;  %p3616_p1 = scmp.lt.s32.totalorder %s2925_s7, %s2925_s7 }
 0xa22   :  { %p3612_p0 = scmp.ne.s32.totalorder %s2925_s7, %s3611_s24  ;;  %p3617_p2 = scmp.lt.s32.totalorder %s3611_s24, %s3611_s24 }
 0xa23   :  { %v963_v52 = vpack.c.bf16 %v961_v51, %v961_v51  ;;  %v3493_v51 = vld [vmem:[%s4428_s4 + $0x10] sm:$0xff]  }
 0xa24   :  { %p3618_p3 = por %p3617_p2, %p3616_p1 }
 0xa25   :  { %3229 = vmatmul.mubr.msk.bf16.vlgmr.msra.gmra.mrb[36].mxu1 %vm274_vm4, %v963_v52  ;;  %v3494_v52 = vld [vmem:[%s4428_s4 + $0x18] sm:$0xff]  }
 0xa26   :  { %3252 = vmatprep.mubr.msk.bf16.mxu1 %vm3637_vm1, %v3636_v14  ;;  %p3619_p4 = pnand %p3618_p3, %p3612_p0 }
 0xac3   :  { %v1006_v56 = vpop.f32.mrb[24].mxu0 }
 0xac4   :  { %v3224_v28 = vpop.f32.mrb[25].mxu0 }
 0xac5   :  { %v1009_v57 = vpop.f32.mrb[26].mxu0 }
 0xac6   :  { %v3225_v58 = vpop.f32.mrb[27].mxu0 }
 0xaf8   :  { %v1054_v60 = vpop.f32.mrb[36].mxu1 }
 0xaf9   :  { %v3451_v61 = vpack.i.bf16 %v1054_v60, %v1006_v56  ;;  %v3230_v62 = vpop.f32.mrb[37].mxu1 }
 0xafa   :  { %v1057_v63 = vpop.f32.mrb[38].mxu1 }
 0xafb   :  { %3452 = vrot.lane.b32.xlu1 %v3451_v61, %s3639_s19  ;;  %v3231_v1 = vpop.f32.mrb[39].mxu1  ;;  %v1205_v61 = vrot.slane %v3993_v21, %v3792_v18  ;;  %v1210_v63 = vsub.s32 2, %v3776_v13 }
 0xafd   :  { %v1211_v5 = vrot.slane %v3993_v21, %v1210_v63 }
 0xb6d   :  { %v3453_v17 = vpop.permute.xlu1 %3452 }
 0xb6e   :  { %v3455_v19 = vunpack.i.h.bf16 %v3453_v17  ;;  %v3454_v22 = vunpack.i.l.bf16 %v3453_v17  ;;  %v3498_v17 = vld [vmem:[%s4428_s4 + $0x38] sm:$0xff]  }
 0xb70   :  { %v1091_v27 = vsel %vm1089_vm6, %v1088_v26, %v3455_v19  ;;  %v1090_v30 = vsel %vm1089_vm6, %v1087_v23, %v3454_v22  ;;  %v2965_v19 = vld [vmem:[%s4430_s6] ss:$0 sm:$0xff] }
 0xb71   :  { %v1092_v31 = vpack.c.bf16 %v1091_v27, %v1090_v30 }
 0xb73   :  { %3241 = vmatmul.mubr.msk.bf16.vlgmr.msra.gmra.mrb[28].mxu0 %vm122_vm0, %v1092_v31 }
 0xb74   :  { %3272 = vmatprep.mubr.msk.bf16.mxu0 %vm3637_vm1, %v3636_v14  ;;  %3257 = vmatpush3.bf16.msra.mxu0 %v3491_v20  ;;  %v3499_v20 = vld [vmem:[%s4432_s8] ss:$8 sps:$4 sm:$0xff]  }
 0xb75   :  { %3258 = vmatprep.subr.bf16.mxu0 %v3636_v14 }
 0xb78   :  { %3259 = vmatpush3.bf16.msra.mxu0 %v3492_v25  ;;  %v3504_v25 = vld [vmem:[%s4432_s8 + $0x14] ss:$8 sps:$4 sm:$0xff]  }
 0xb79   :  { %3260 = vmatprep.subr.bf16.mxu0 %v3636_v14 }
 0xb7c   :  { %3261 = vmatpush3.bf16.msra.mxu0 %v3493_v51  ;;  %v3502_v51 = vld [vmem:[%s4432_s8 + $0x10] ss:$8 sps:$4 sm:$0xff]  }
 0xb7d   :  { %3262 = vmatprep.subr.bf16.mxu0 %v3636_v14 }
 0xb80   :  { %3263 = vmatpush3.bf16.msra.mxu0 %v3494_v52  ;;  %v3507_v52 = vld [vmem:[%s4432_s8 + $0x24] ss:$8 sps:$4 sm:$0xff]  }
 0xb81   :  { %3264 = vmatprep.subr.bf16.mxu0 %v3636_v14 }
 0xb84   :  { %3265 = vmatpush3.bf16.msra.mxu0 %v3495_v53  ;;  %v3505_v53 = vld [vmem:[%s4432_s8 + $0x20] ss:$8 sps:$4 sm:$0xff]  }
 0xb85   :  { %3266 = vmatprep.subr.bf16.mxu0 %v3636_v14 }
 0xb88   :  { %3267 = vmatpush3.bf16.msra.mxu0 %v3496_v54  ;;  %v3508_v54 = vld [vmem:[%s4432_s8 + $0x30] ss:$8 sps:$4 sm:$0xff]  }
 0xb89   :  { %3268 = vmatprep.subr.bf16.mxu0 %v3636_v14 }
 0xb8c   :  { %3269 = vmatpush3.bf16.msra.mxu0 %v3497_v16 }
 0xb8d   :  { %3270 = vmatprep.subr.bf16.mxu0 %v3636_v14 }
 0xb90   :  { %3271 = vmatpush3.bf16.msra.mxu0 %v3498_v17 }
 0xb91   :  { %3288 = vmatprep.subr.bf16.mxu0 %v3636_v14 }
 0xc46   :  { %v1166_v32 = vpop.f32.mrb[28].mxu0 }
 0xc47   :  { %v1167_v33 = vadd.f32 %v1166_v32, %v1104_v29  ;;  %v3242_v35 = vpop.f32.mrb[29].mxu0 }
 0xc48   :  { %v1169_v36 = vpop.f32.mrb[30].mxu0 }
 0xc49   :  { %v1170_v37 = vadd.f32 %v1169_v36, %v1104_v29  ;;  %v3243_v38 = vpop.f32.mrb[31].mxu0  ;;  %v1173_v39 = vadd.f32 %v1167_v33, %v3766_v9  ;;  %v1319_v33 = vsub.s32 3, %v3776_v13 }
 0xc4b   :  { %v1175_v40 = vsel %vm122_vm0, %v1173_v39, 0.0  ;;  %v1174_v41 = vadd.f32 %v1170_v37, %v3771_v10  ;;  %v3487_v10 = vld [vmem:[%s4427_s3] sm:$0xff]   ;;  %v1320_v35 = vrot.slane %v3993_v21, %v1319_v33 }
 0xc4c   :  { %1176 = vadd.xlane.f32.xlu0 %v1175_v40  ;;  %3245 = vmatpush3.bf16.msra.mxu1 %v3487_v10 }
 0xc4d   :  { %v1178_v42 = vsel %vm122_vm0, %v1174_v41, 0.0  ;;  %3246 = vmatprep.subr.bf16.mxu1 %v3636_v14 }
 0xc4e   :  { %1179 = vadd.xlane.f32.xlu1 %v1178_v42 }
 0xc50   :  { %3247 = vmatpush3.bf16.msra.mxu1 %v3488_v50 }
 0xc51   :  { %3248 = vmatprep.subr.bf16.mxu1 %v3636_v14 }
 0xc54   :  { %3249 = vmatpush3.bf16.msra.mxu1 %v3489_v0 }
 0xc55   :  { %3250 = vmatprep.subr.bf16.mxu1 %v3636_v14 }
 0xc58   :  { %3251 = vmatpush3.bf16.msra.mxu1 %v3490_v6  ;;  %v3501_v6 = vld [vmem:[%s4432_s8 + $0x4] ss:$8 sps:$4 sm:$0xff]  }
 0xc59   :  { %1515 = vmatprep.subr.bf16.mxu1 %v3501_v6 }
 0xcd9   :  { %v1177_v43 = vpop.xlane.xlu0 %1176 }
 0xcda   :  { %v1182_v44 = vmul.f32 0.015625, %v1177_v43 }
 0xcdb   :  { %v1180_v45 = vpop.xlane.xlu1 %1179 }
 0xcdc   :  { %v1184_v46 = vsub.f32 %v1173_v39, %v1182_v44  ;;  %v1183_v24 = vmul.f32 0.015625, %v1180_v45 }
 0xcde   :  { %v1185_v34 = vsub.f32 %v1174_v41, %v1183_v24  ;;  %v1186_v47 = vmul.f32 %v1184_v46, %v1184_v46 }
 0xce0   :  { %v1188_v48 = vsel %vm122_vm0, %v1186_v47, 0.0  ;;  %v1187_v49 = vmul.f32 %v1185_v34, %v1185_v34 }
 0xce1   :  { %1189 = vadd.xlane.f32.xlu0 %v1188_v48 }
 0xce2   :  { %v1191_v9 = vsel %vm122_vm0, %v1187_v49, 0.0 }
 0xce5   :  { %1192 = vadd.xlane.f32.xlu0 %v1191_v9 }
 0xd6e   :  { %v1190_v55 = vpop.xlane.xlu0 %1189 }
 0xd6f   :  { %v1194_v56 = vmul.f32 0.015625, %v1190_v55  ;;  %v3510_v55 = vld [vmem:[%s4432_s8 + $0x34] ss:$8 sps:$4 sm:$0xff]  }
 0xd71   :  { %v1196_v28 = vadd.f32 1e-05, %v1194_v56 }
 0xd72   :  { %v1193_v57 = vpop.xlane.xlu0 %1192 }
 0xd73   :  { %3563 = vrsqrt.f32 %v1196_v28  ;;  %v1195_v58 = vmul.f32 0.015625, %v1193_v57 }
 0xd75   :  { %v1197_v59 = vadd.f32 1e-05, %v1195_v58 }
 0xd77   :  { %3565 = vrsqrt.f32 %v1197_v59 }
 0xd7d   :  { %v3564_v60 = vpop.eup %3563 }
 0xd7e   :  { %v1200_v62 = vmul.f32 %v3564_v60, %v1184_v46 }
 0xd80   :  { %v1206_v3 = vmul.f32 %v1205_v61, %v1200_v62 }
 0xd81   :  { %v3566_v1 = vpop.eup %3565 }
 0xd82   :  { %v1201_v4 = vmul.f32 %v3566_v1, %v1185_v34  ;;  %v1212_v8 = vadd.f32 %v1211_v5, %v1206_v3  ;;  %v1446_v1 = vsub.s32 5, %v3776_v13 }
 0xd84   :  { %v1207_v7 = vmul.f32 %v1205_v61, %v1201_v4  ;;  %v1440_v61 = vsub.s32 4, %v3776_v13 }
 0xd86   :  { %v1213_v11 = vadd.f32 %v1211_v5, %v1207_v7  ;;  %v1441_v62 = vrot.slane %v3993_v21, %v1440_v61 }
 0xd88   :  { %v1214_v12 = vpack.c.bf16 %v1213_v11, %v1212_v8 }
 0xd8a   :  { %3253 = vmatmul.mubr.msk.bf16.vlgmr.msra.gmra.mrb[40].mxu1 %vm122_vm0, %v1214_v12 }
 0xd8b   :  { %1547 = vmatprep.mubr.bf16.mxu1 %v3635_v2  ;;  %1516 = vmatpush1.bf16.msra.mxu1 %v3499_v20 }
 0xd8c   :  { %1517 = vmatprep.subr.bf16.mxu1 %v3504_v25 }
 0xd8f   :  { %1518 = vmatpush1.bf16.msra.mxu1 %v3502_v51 }
 0xd90   :  { %1519 = vmatprep.subr.bf16.mxu1 %v3507_v52 }
 0xd93   :  { %1520 = vmatpush1.bf16.msra.mxu1 %v3505_v53 }
 0xd94   :  { %1521 = vmatprep.subr.bf16.mxu1 %v3510_v55 }
 0xd97   :  { %1522 = vmatpush1.bf16.msra.mxu1 %v3508_v54 }
 0xd98   :  { %3276 = vmatprep.subr.bf16.mxu1 %v3636_v14 }
 0xe5d   :  { %v1291_v22 = vpop.f32.mrb[40].mxu1 }
 0xe5e   :  { %v1292_v2 = vadd.f32 %v2965_v19, %v1291_v22  ;;  %v3254_v23 = vpop.f32.mrb[41].mxu1  ;;  %v1460_v22 = vld [vmem:[%s4436_s12] sm:$0x3] }
 0xe5f   :  { %v1294_v26 = vpop.f32.mrb[42].mxu1 }
 0xe60   :  { %v1295_v27 = vadd.f32 %v2965_v19, %v1294_v26  ;;  %v3255_v30 = vpop.f32.mrb[43].mxu1  ;;  %v1298_v31 = vmax.f32 %v1292_v2, 0.0  ;;  %v1465_v2 = vrot.slane %v1460_v22, %v3781_v15 }
 0xe62   :  { %v1299_v29 = vmax.f32 %v1295_v27, 0.0 }
 0xe64   :  { %v1300_v32 = vpack.c.bf16 %v1299_v29, %v1298_v31 }
 0xe66   :  { %3273 = vmatmul.mubr.bf16.vlgmr.msra.gmra.mrb[32].mxu0 %v1300_v32 }
 0xe67   :  { %3290 = vmatprep.mubr.msk.bf16.mxu0 %vm3637_vm1, %v3636_v14 }
 0xf39   :  { %v1403_v36 = vpop.f32.mrb[32].mxu0 }
 0xf3a   :  { %v1404_v37 = vadd.f32 %v1403_v36, %v1320_v35  ;;  %v3274_v38 = vpop.f32.mrb[33].mxu0 }
 0xf3b   :  { %v1406_v39 = vpop.f32.mrb[34].mxu0 }
 0xf3c   :  { %v1407_v40 = vadd.f32 %v1406_v39, %v1320_v35  ;;  %v3275_v41 = vpop.f32.mrb[35].mxu0  ;;  %v1410_v42 = vadd.f32 %v1404_v37, %v1212_v8 }
 0xf3e   :  { %v1412_v43 = vsel %vm122_vm0, %v1410_v42, 0.0  ;;  %v1411_v44 = vadd.f32 %v1407_v40, %v1213_v11  ;;  %v1447_v11 = vrot.slane %v3993_v21, %v1446_v1  ;;  %v1469_v21 = vrot.slane %v1460_v22, %v3792_v18 }
 0xf3f   :  { %1413 = vadd.xlane.f32.xlu1 %v1412_v43 }
 0xf40   :  { %v1415_v45 = vsel %vm122_vm0, %v1411_v44, 0.0 }
 0xf41   :  { %1416 = vadd.xlane.f32.xlu0 %v1415_v45 }
 0xfcc   :  { %v1414_v46 = vpop.xlane.xlu1 %1413 }
 0xfcd   :  { %v1418_v24 = vmul.f32 0.015625, %v1414_v46 }
 0xfce   :  { %v1417_v34 = vpop.xlane.xlu0 %1416 }
 0xfcf   :  { %v1420_v47 = vsub.f32 %v1410_v42, %v1418_v24  ;;  %v1419_v48 = vmul.f32 0.015625, %v1417_v34 }
 0xfd1   :  { %v1421_v49 = vsub.f32 %v1411_v44, %v1419_v48  ;;  %v1422_v9 = vmul.f32 %v1420_v47, %v1420_v47 }
 0xfd3   :  { %v1424_v10 = vsel %vm122_vm0, %v1422_v9, 0.0  ;;  %v1423_v50 = vmul.f32 %v1421_v49, %v1421_v49 }
 0xfd4   :  { %1425 = vadd.xlane.f32.xlu1 %v1424_v10 }
 0xfd5   :  { %v1427_v0 = vsel %vm122_vm0, %v1423_v50, 0.0 }
 0xfd6   :  { %1428 = vadd.xlane.f32.xlu0 %v1427_v0 }
0x1061   :  { %v1426_v56 = vpop.xlane.xlu1 %1425 }
0x1062   :  { %v1430_v28 = vmul.f32 0.015625, %v1426_v56 }
0x1063   :  { %v1429_v57 = vpop.xlane.xlu0 %1428 }
0x1064   :  { %v1432_v58 = vadd.f32 1e-05, %v1430_v28  ;;  %v1431_v59 = vmul.f32 0.015625, %v1429_v57 }
0x1066   :  { %3567 = vrsqrt.f32 %v1432_v58  ;;  %v1433_v60 = vadd.f32 1e-05, %v1431_v59 }
0x1068   :  { %3569 = vrsqrt.f32 %v1433_v60 }
0x1070   :  { %v3568_v3 = vpop.eup %3567 }
0x1071   :  { %v1436_v4 = vmul.f32 %v3568_v3, %v1420_v47 }
0x1072   :  { %v3570_v5 = vpop.eup %3569 }
0x1073   :  { %v1442_v7 = vmul.f32 %v1441_v62, %v1436_v4  ;;  %v1437_v8 = vmul.f32 %v3570_v5, %v1421_v49 }
0x1075   :  { %v1443_v12 = vmul.f32 %v1441_v62, %v1437_v8  ;;  %v4104_v16 = vadd.f32 %v1447_v11, %v1442_v7 }
0x1077   :  { %v4106_v17 = vadd.f32 %v1447_v11, %v1443_v12 }
0x1079   :  { %v1451_v19 = vpack.c.bf16 %v4106_v17, %v4104_v16 }
0x107b   :  { %2987 = vmatmul.mubr.msk.bf16.vlgmr.msra.gmra.mrb[44].mxu1 %vm122_vm0, %v1451_v19 }
0x107c   :  { %3278 = vmatprep.mubr.msk.bf16.mxu1 %vm3637_vm1, %v3636_v14 }
0x114e   :  { %v1549_v23 = vpop.f32.mrb[44].mxu1 }
0x114f   :  { %v1550_v26 = vadd.f32 %v1549_v23, %v1465_v2  ;;  %v1551_v27 = vpop.f32.mrb[45].mxu1 }
0x1150   :  { %v1552_v30 = vadd.f32 %v1551_v27, %v1469_v21  ;;  %v1553_v31 = vpop.f32.mrb[46].mxu1 }
0x1151   :  { %v4118_v29 = vpack.c.bf16 %v1550_v26, %v1550_v26  ;;  %v1554_v32 = vadd.f32 %v1553_v31, %v1465_v2  ;;  %v1555_v35 = vpop.f32.mrb[47].mxu1 }
0x1152   :  { %v4120_v36 = vpack.c.bf16 %v1552_v30, %v1552_v30  ;;  %v1556_v37 = vadd.f32 %v1555_v35, %v1469_v21 }
0x1153   :  { %v4122_v38 = vpack.c.bf16 %v1554_v32, %v1554_v32  ;;  %1563 = vrot.lane.b32.xlu1 %v4118_v29, %s3638_s5 }
0x1154   :  { %v1690_v39 = vsel %vm302_vm3, %v4120_v36, 0  ;;  %v4139_v44 = vpack.c.bf16 %v1556_v37, %v1556_v37 }
0x1155   :  { %1612 = vrot.lane.b32.xlu0 %v4122_v38, %s3638_s5  ;;  %3289 = vmatpush3.bf16.msra.mxu0 %v1690_v39 }
0x1156   :  { %3300 = vmatprep.subr.bf16.mxu0 %v3636_v14  ;;  %v1736_v45 = vsel %vm302_vm3, %v4139_v44, 0 }
0x11c5   :  { %v1564_v40 = vpop.permute.xlu1 %1563 }
0x11c6   :  { %v1569_v41 = vsel %vm176_vm2, %v1564_v40, 0 }
0x11c7   :  { %3277 = vmatpush3.bf16.xpose.msra.mxu1 %v1569_v41  ;;  %v1613_v42 = vpop.permute.xlu0 %1612 }
0x11c8   :  { %3282 = vmatprep.subr.bf16.mxu1 %v3636_v14  ;;  %v1618_v43 = vsel %vm176_vm2, %v1613_v42, 0 }
0x11ce   :  { %3279 = vmatmul.mubr.msk.bf16.vlgmr.msra.gmra.mrb[48].mxu1 %vm176_vm2, %v4118_v29 }
0x11cf   :  { %3283 = vmatpush3.bf16.xpose.msra.mxu1 %v1618_v43  ;;  %3284 = vmatprep.mubr.msk.bf16.mxu1 %vm3637_vm1, %v3636_v14 }
0x11d0   :  { %3294 = vmatprep.subr.bf16.mxu1 %v3636_v14 }
0x11d6   :  { %3285 = vmatmul.mubr.msk.bf16.vlgmr.msra.gmra.mrb[52].mxu1 %vm176_vm2, %v4122_v38 }
0x11d7   :  { %3295 = vmatpush3.bf16.msra.mxu1 %v1736_v45  ;;  %3296 = vmatprep.mubr.msk.bf16.mxu1 %vm3637_vm1, %v3636_v14 }
0x11d8   :  { %3306 = vmatprep.subr.bf16.mxu1 %v3636_v14 }
0x12a1   :  { %v1605_v46 = vpop.f32.mrb[48].mxu1 }
0x12a2   :  { %v1660_v24 = vmul.f32 0.25, %v1605_v46  ;;  %v3280_v34 = vpop.f32.mrb[49].mxu1 }
0x12a3   :  { %v1608_v47 = vpop.f32.mrb[50].mxu1 }
0x12a4   :  { %v3281_v48 = vpop.f32.mrb[51].mxu1  ;;  %v1662_v49 = vsel %vm274_vm4, %v1660_v24, -inf }
0x12a5   :  { %1663 = vmax.xlane.f32.xlu1 %v1662_v49 }
0x12a9   :  { %v1654_v9 = vpop.f32.mrb[52].mxu1 }
0x12aa   :  { %v1661_v10 = vmul.f32 0.25, %v1654_v9  ;;  %v3286_v50 = vpop.f32.mrb[53].mxu1 }
0x12ab   :  { %v1657_v0 = vpop.f32.mrb[54].mxu1 }
0x12ac   :  { %v3287_v6 = vpop.f32.mrb[55].mxu1  ;;  %v1665_v20 = vsel %vm274_vm4, %v1661_v10, -inf }
0x12ad   :  { %1666 = vmax.xlane.f32.xlu0 %v1665_v20 }
0x12b6   :  { %1780 = vrot.lane.b32.xlu1 %v4118_v29, %s3639_s19 }
0x1332   :  { %v1664_v25 = vpop.xlane.xlu1 %1663 }
0x1333   :  { %v1668_v51 = vsub.f32 %v1660_v24, %v1664_v25 }
0x1335   :  { %v1670_v52 = vmul.f32 1.442695, %v1668_v51 }
0x1336   :  { %v1781_v59 = vpop.permute.xlu1 %1780 }
0x1337   :  { %3571 = vpow2.f32 %v1670_v52  ;;  %v1786_v7 = vsel %vm176_vm2, %v1781_v59, 0 }
0x133a   :  { %v1667_v53 = vpop.xlane.xlu0 %1666 }
0x133b   :  { %v1669_v54 = vsub.f32 %v1661_v10, %v1667_v53 }
0x133d   :  { %v1672_v55 = vmul.f32 1.442695, %v1669_v54 }
0x133f   :  { %3573 = vpow2.f32 %v1672_v55 }
0x1341   :  { %v3572_v56 = vpop.eup %3571 }
0x1342   :  { %v1674_v28 = vsel %vm274_vm4, %v3572_v56, 0.0 }
0x1343   :  { %1675 = vadd.xlane.f32.xlu1 %v1674_v28 }
0x1349   :  { %v3574_v57 = vpop.eup %3573 }
0x134a   :  { %v1677_v58 = vsel %vm274_vm4, %v3574_v57, 0.0 }
0x134b   :  { %1678 = vadd.xlane.f32.xlu0 %v1677_v58 }
0x1354   :  { %1778 = vrot.lane.b32.xlu1 %v4118_v29, %s3640_s1 }
0x1358   :  { %1828 = vrot.lane.b32.xlu1 %v4122_v38, %s3640_s1 }
0x1361   :  { %1830 = vrot.lane.b32.xlu0 %v4122_v38, %s3639_s19 }
0x13d0   :  { %v1676_v60 = vpop.xlane.xlu1 %1675 }
0x13d1   :  { %3575 = vrcp.f32 %v1676_v60 }
0x13d4   :  { %v1779_v22 = vpop.permute.xlu1 %1778 }
0x13d8   :  { %v1679_v62 = vpop.xlane.xlu0 %1678  ;;  %v1829_v21 = vpop.permute.xlu1 %1828 }
0x13d9   :  { %3577 = vrcp.f32 %v1679_v62 }
0x13db   :  { %v3576_v3 = vpop.eup %3575 }
0x13dc   :  { %v1682_v4 = vmul.f32 %v3576_v3, %v3572_v56  ;;  %v1831_v12 = vpop.permute.xlu0 %1830 }
0x13dd   :  { %v1836_v2 = vsel %vm176_vm2, %v1831_v12, 0 }
0x13de   :  { %v1684_v5 = vpack.c.bf16 %v1682_v4, %v1682_v4 }
0x13e0   :  { %3291 = vmatmul.mubr.msk.bf16.vlgmr.msra.gmra.mrb[36].mxu0 %vm274_vm4, %v1684_v5 }
0x13e1   :  { %3301 = vmatpush3.bf16.xpose.msra.mxu0 %v1786_v7  ;;  %3302 = vmatprep.mubr.msk.bf16.mxu0 %vm3637_vm1, %v3636_v14 }
0x13e2   :  { %3312 = vmatprep.subr.bf16.mxu0 %v3636_v14 }
0x13e3   :  { %v3578_v8 = vpop.eup %3577 }
0x13e4   :  { %v1683_v11 = vmul.f32 %v3578_v8, %v3574_v57 }
0x13e6   :  { %v1685_v19 = vpack.c.bf16 %v1683_v11, %v1683_v11 }
0x13e8   :  { %3297 = vmatmul.mubr.msk.bf16.vlgmr.msra.gmra.mrb[56].mxu1 %vm274_vm4, %v1685_v19  ;;  %3303 = vmatmul.mubr.msk.bf16.vlgmr.msra.gmra.mrb[40].mxu0 %vm176_vm2, %v1779_v22 }
0x13e9   :  { %3307 = vmatpush3.bf16.xpose.msra.mxu1 %v1836_v2  ;;  %3308 = vmatprep.mubr.msk.bf16.mxu1 %vm3637_vm1, %v3636_v14 }
0x13ea   :  { %3318 = vmatprep.subr.bf16.mxu1 %v3636_v14  ;;  %3314 = vmatprep.mubr.msk.bf16.mxu0 %vm3637_vm1, %v3636_v14 }
0x13f0   :  { %3309 = vmatmul.mubr.msk.bf16.vlgmr.msra.gmra.mrb[60].mxu1 %vm176_vm2, %v1829_v21 }
0x13f1   :  { %3320 = vmatprep.mubr.msk.bf16.mxu1 %vm3637_vm1, %v3636_v14 }
0x14b3   :  { %v4176_v23 = vpop.f32.mrb[36].mxu0 }
0x14b4   :  { %v3292_v26 = vpop.f32.mrb[37].mxu0 }
0x14b5   :  { %v1729_v27 = vpop.f32.mrb[38].mxu0 }
0x14b6   :  { %v3293_v30 = vpop.f32.mrb[39].mxu0 }
0x14bb   :  { %v4178_v31 = vpop.f32.mrb[56].mxu1  ;;  %v1822_v32 = vpop.f32.mrb[40].mxu0 }
0x14bc   :  { %v1878_v35 = vmul.f32 0.25, %v1822_v32  ;;  %v3298_v37 = vpop.f32.mrb[57].mxu1  ;;  %v3304_v39 = vpop.f32.mrb[41].mxu0 }
0x14bd   :  { %v1775_v40 = vpop.f32.mrb[58].mxu1  ;;  %v1825_v41 = vpop.f32.mrb[42].mxu0 }
0x14be   :  { %v3299_v42 = vpop.f32.mrb[59].mxu1  ;;  %v3305_v43 = vpop.f32.mrb[43].mxu0  ;;  %v1880_v45 = vsel %vm274_vm4, %v1878_v35, -inf }
0x14bf   :  { %1881 = vmax.xlane.f32.xlu0 %v1880_v45 }
0x14c3   :  { %v1872_v46 = vpop.f32.mrb[60].mxu1 }
0x14c4   :  { %v1879_v24 = vmul.f32 0.25, %v1872_v46  ;;  %v3310_v34 = vpop.f32.mrb[61].mxu1 }
0x14c5   :  { %v1875_v47 = vpop.f32.mrb[62].mxu1 }
0x14c6   :  { %v3311_v48 = vpop.f32.mrb[63].mxu1  ;;  %v1883_v49 = vsel %vm274_vm4, %v1879_v24, -inf }
0x14c7   :  { %1884 = vmax.xlane.f32.xlu1 %v1883_v49 }
0x14d8   :  { %1905 = vrot.lane.b32.xlu1 %v4120_v36, %s3640_s1 }
0x14dc   :  { %2004 = vrot.lane.b32.xlu1 %v4118_v29, %s3641_s20 }
0x14e0   :  { %2054 = vrot.lane.b32.xlu1 %v4122_v38, %s3641_s20 }
0x14e4   :  { %2052 = vrot.lane.b32.xlu1 %v4122_v38, %s3642_s21 }
0x154c   :  { %v1882_v9 = vpop.xlane.xlu0 %1881 }
0x154d   :  { %v1886_v10 = vsub.f32 %v1878_v35, %v1882_v9 }
0x154f   :  { %v1888_v50 = vmul.f32 1.442695, %v1886_v10 }
0x1551   :  { %3579 = vpow2.f32 %v1888_v50 }
0x1554   :  { %v1885_v0 = vpop.xlane.xlu1 %1884 }
0x1555   :  { %v1887_v6 = vsub.f32 %v1879_v24, %v1885_v0 }
0x1557   :  { %v1890_v20 = vmul.f32 1.442695, %v1887_v6 }
0x1558   :  { %v1906_v25 = vpop.permute.xlu1 %1905 }
0x1559   :  { %3581 = vpow2.f32 %v1890_v20  ;;  %v1911_v51 = vsel %vm302_vm3, %v1906_v25, 0 }
0x155a   :  { %3313 = vmatpush3.bf16.msra.mxu0 %v1911_v51 }
0x155b   :  { %v3580_v52 = vpop.eup %3579  ;;  %3324 = vmatprep.subr.bf16.mxu0 %v3636_v14 }
0x155c   :  { %v1892_v53 = vsel %vm274_vm4, %v3580_v52, 0.0  ;;  %v2005_v60 = vpop.permute.xlu1 %2004 }
0x155d   :  { %1893 = vadd.xlane.f32.xlu0 %v1892_v53  ;;  %v2010_v4 = vsel %vm176_vm2, %v2005_v60, 0 }
0x1560   :  { %v2055_v8 = vpop.permute.xlu1 %2054 }
0x1561   :  { %v2060_v19 = vsel %vm176_vm2, %v2055_v8, 0 }
0x1563   :  { %v3582_v54 = vpop.eup %3581 }
0x1564   :  { %v1895_v55 = vsel %vm274_vm4, %v3582_v54, 0.0  ;;  %v2053_v22 = vpop.permute.xlu1 %2052 }
0x1565   :  { %1896 = vadd.xlane.f32.xlu0 %v1895_v55 }
0x157b   :  { %1954 = vrot.lane.b32.xlu0 %v4139_v44, %s3640_s1 }
0x157f   :  { %2002 = vrot.lane.b32.xlu0 %v4118_v29, %s3642_s21 }
0x15ea   :  { %v1894_v56 = vpop.xlane.xlu0 %1893 }
0x15eb   :  { %3583 = vrcp.f32 %v1894_v56 }
0x15f2   :  { %v1897_v28 = vpop.xlane.xlu0 %1896 }
0x15f3   :  { %3585 = vrcp.f32 %v1897_v28 }
0x15f5   :  { %v3584_v57 = vpop.eup %3583 }
0x15f6   :  { %v1900_v58 = vmul.f32 %v3584_v57, %v3580_v52  ;;  %v1955_v59 = vpop.permute.xlu0 %1954 }
0x15f7   :  { %v1960_v62 = vsel %vm302_vm3, %v1955_v59, 0 }
0x15f8   :  { %3319 = vmatpush3.bf16.msra.mxu1 %v1960_v62  ;;  %v1902_v3 = vpack.c.bf16 %v1900_v58, %v1900_v58 }
0x15f9   :  { %3330 = vmatprep.subr.bf16.mxu1 %v3636_v14 }
0x15fa   :  { %3315 = vmatmul.mubr.msk.bf16.vlgmr.msra.gmra.mrb[44].mxu0 %vm274_vm4, %v1902_v3  ;;  %v2003_v12 = vpop.permute.xlu0 %2002 }
0x15fb   :  { %3325 = vmatpush3.bf16.xpose.msra.mxu0 %v2010_v4  ;;  %3326 = vmatprep.mubr.msk.bf16.mxu0 %vm3637_vm1, %v3636_v14 }
0x15fc   :  { %3336 = vmatprep.subr.bf16.mxu0 %v3636_v14 }
0x15fd   :  { %v3586_v5 = vpop.eup %3585 }
0x15fe   :  { %v1901_v7 = vmul.f32 %v3586_v5, %v3582_v54 }
0x1600   :  { %v1903_v11 = vpack.c.bf16 %v1901_v7, %v1901_v7 }
0x1602   :  { %3321 = vmatmul.mubr.msk.bf16.vlgmr.msra.gmra.mrb[64].mxu1 %vm274_vm4, %v1903_v11  ;;  %3327 = vmatmul.mubr.msk.bf16.vlgmr.msra.gmra.mrb[48].mxu0 %vm176_vm2, %v2003_v12 }
0x1603   :  { %3331 = vmatpush3.bf16.xpose.msra.mxu1 %v2060_v19  ;;  %3332 = vmatprep.mubr.msk.bf16.mxu1 %vm3637_vm1, %v3636_v14 }
0x1604   :  { %3342 = vmatprep.subr.bf16.mxu1 %v3636_v14  ;;  %3338 = vmatprep.mubr.msk.bf16.mxu0 %vm3637_vm1, %v3636_v14 }
0x160a   :  { %3333 = vmatmul.mubr.msk.bf16.vlgmr.msra.gmra.mrb[68].mxu1 %vm176_vm2, %v2053_v22 }
0x160b   :  { %3344 = vmatprep.mubr.msk.bf16.mxu1 %vm3637_vm1, %v3636_v14 }
0x16cd   :  { %v4216_v2 = vpop.f32.mrb[44].mxu0 }
0x16ce   :  { %v3316_v21 = vpop.f32.mrb[45].mxu0 }
0x16cf   :  { %v1950_v26 = vpop.f32.mrb[46].mxu0 }
0x16d0   :  { %v3317_v27 = vpop.f32.mrb[47].mxu0 }
0x16d5   :  { %v4218_v30 = vpop.f32.mrb[64].mxu1  ;;  %v2046_v32 = vpop.f32.mrb[48].mxu0 }
0x16d6   :  { %v3456_v35 = vpack.i.bf16 %v4218_v30, %v4216_v2  ;;  %v2102_v37 = vmul.f32 0.25, %v2046_v32  ;;  %v3322_v39 = vpop.f32.mrb[65].mxu1  ;;  %v3328_v40 = vpop.f32.mrb[49].mxu0 }
0x16d7   :  { %v1999_v41 = vpop.f32.mrb[66].mxu1  ;;  %v2049_v42 = vpop.f32.mrb[50].mxu0 }
0x16d8   :  { %v3323_v43 = vpop.f32.mrb[67].mxu1  ;;  %v3329_v45 = vpop.f32.mrb[51].mxu0  ;;  %v2104_v46 = vsel %vm274_vm4, %v2102_v37, -inf }
0x16d9   :  { %2105 = vmax.xlane.f32.xlu0 %v2104_v46 }
0x16dd   :  { %v2096_v24 = vpop.f32.mrb[68].mxu1 }
0x16de   :  { %v2103_v34 = vmul.f32 0.25, %v2096_v24  ;;  %v3334_v47 = vpop.f32.mrb[69].mxu1 }
0x16df   :  { %v2099_v48 = vpop.f32.mrb[70].mxu1 }
0x16e0   :  { %v3335_v49 = vpop.f32.mrb[71].mxu1  ;;  %v2107_v9 = vsel %vm274_vm4, %v2103_v34, -inf }
0x16e1   :  { %2108 = vmax.xlane.f32.xlu1 %v2107_v9 }
0x16f2   :  { %2128 = vrot.lane.b32.xlu1 %v4120_v36, %s3642_s21 }
0x16f6   :  { %2226 = vrot.lane.b32.xlu1 %v4118_v29, %s3643_s22 }
0x16fa   :  { %2276 = vrot.lane.b32.xlu1 %v4122_v38, %s3643_s22 }
0x16fe   :  { %2274 = vrot.lane.b32.xlu1 %v4122_v38, %s3644_s23 }
0x1766   :  { %v2106_v10 = vpop.xlane.xlu0 %2105 }
0x1767   :  { %v2110_v50 = vsub.f32 %v2102_v37, %v2106_v10 }
0x1769   :  { %v2112_v0 = vmul.f32 1.442695, %v2110_v50 }
0x176b   :  { %3587 = vpow2.f32 %v2112_v0 }
0x176e   :  { %v2109_v6 = vpop.xlane.xlu1 %2108 }
0x176f   :  { %v2111_v20 = vsub.f32 %v2103_v34, %v2109_v6 }
0x1771   :  { %v2114_v25 = vmul.f32 1.442695, %v2111_v20 }
0x1772   :  { %v2129_v51 = vpop.permute.xlu1 %2128 }
0x1773   :  { %3589 = vpow2.f32 %v2114_v25  ;;  %v2134_v52 = vsel %vm302_vm3, %v2129_v51, 0 }
0x1774   :  { %3337 = vmatpush3.bf16.msra.mxu0 %v2134_v52 }
0x1775   :  { %v3588_v53 = vpop.eup %3587  ;;  %3348 = vmatprep.subr.bf16.mxu0 %v3636_v14 }
0x1776   :  { %v2116_v54 = vsel %vm274_vm4, %v3588_v53, 0.0  ;;  %v2227_v60 = vpop.permute.xlu1 %2226 }
0x1777   :  { %2117 = vadd.xlane.f32.xlu0 %v2116_v54  ;;  %v2232_v4 = vsel %vm176_vm2, %v2227_v60, 0 }
0x177a   :  { %v2277_v7 = vpop.permute.xlu1 %2276 }
0x177b   :  { %v2282_v12 = vsel %vm176_vm2, %v2277_v7, 0 }
0x177d   :  { %v3590_v55 = vpop.eup %3589 }
0x177e   :  { %v2119_v38 = vsel %vm274_vm4, %v3590_v55, 0.0  ;;  %v2275_v19 = vpop.permute.xlu1 %2274 }
0x177f   :  { %2120 = vadd.xlane.f32.xlu0 %v2119_v38 }
0x1795   :  { %2176 = vrot.lane.b32.xlu0 %v4139_v44, %s3642_s21 }
0x1799   :  { %2224 = vrot.lane.b32.xlu0 %v4118_v29, %s3644_s23 }
0x1804   :  { %v2118_v56 = vpop.xlane.xlu0 %2117 }
0x1805   :  { %3591 = vrcp.f32 %v2118_v56 }
0x180c   :  { %v2121_v28 = vpop.xlane.xlu0 %2120 }
0x180d   :  { %3593 = vrcp.f32 %v2121_v28 }
0x180f   :  { %v3592_v57 = vpop.eup %3591 }
0x1810   :  { %v2124_v58 = vmul.f32 %v3592_v57, %v3588_v53  ;;  %v2177_v59 = vpop.permute.xlu0 %2176 }
0x1811   :  { %v2182_v62 = vsel %vm302_vm3, %v2177_v59, 0 }
0x1812   :  { %3343 = vmatpush3.bf16.msra.mxu1 %v2182_v62  ;;  %v2126_v3 = vpack.c.bf16 %v2124_v58, %v2124_v58 }
0x1813   :  { %3354 = vmatprep.subr.bf16.mxu1 %v3636_v14 }
0x1814   :  { %3339 = vmatmul.mubr.msk.bf16.vlgmr.msra.gmra.mrb[52].mxu0 %vm274_vm4, %v2126_v3  ;;  %v2225_v11 = vpop.permute.xlu0 %2224  ;;  %v3511_v3 = vld [vmem:[%s4433_s9] sm:$0xff]  }
0x1815   :  { %3349 = vmatpush3.bf16.xpose.msra.mxu0 %v2232_v4  ;;  %3350 = vmatprep.mubr.msk.bf16.mxu0 %vm3637_vm1, %v3636_v14  ;;  %v3512_v4 = vld [vmem:[%s4433_s9 + $0x8] sm:$0xff]  }
0x1816   :  { %3360 = vmatprep.subr.bf16.mxu0 %v3636_v14 }
0x1817   :  { %v3594_v29 = vpop.eup %3593 }
0x1818   :  { %v2125_v5 = vmul.f32 %v3594_v29, %v3590_v55  ;;  %v3513_v29 = vld [vmem:[%s4433_s9 + $0x10] sm:$0xff]  }
0x181a   :  { %v2127_v8 = vpack.c.bf16 %v2125_v5, %v2125_v5  ;;  %v3514_v5 = vld [vmem:[%s4433_s9 + $0x18] sm:$0xff]  }
0x181c   :  { %3345 = vmatmul.mubr.msk.bf16.vlgmr.msra.gmra.mrb[72].mxu1 %vm274_vm4, %v2127_v8  ;;  %3351 = vmatmul.mubr.msk.bf16.vlgmr.msra.gmra.mrb[56].mxu0 %vm176_vm2, %v2225_v11 }
0x181d   :  { %3355 = vmatpush3.bf16.xpose.msra.mxu1 %v2282_v12  ;;  %3356 = vmatprep.mubr.msk.bf16.mxu1 %vm3637_vm1, %v3636_v14 }
0x181e   :  { %3366 = vmatprep.subr.bf16.mxu1 %v3636_v14  ;;  %3362 = vmatprep.mubr.msk.bf16.mxu0 %vm3637_vm1, %v3636_v14 }
0x1824   :  { %3357 = vmatmul.mubr.msk.bf16.vlgmr.msra.gmra.mrb[76].mxu1 %vm176_vm2, %v2275_v19 }
0x1825   :  { %3368 = vmatprep.mubr.msk.bf16.mxu1 %vm3637_vm1, %v3636_v14 }
0x18e7   :  { %v2170_v22 = vpop.f32.mrb[52].mxu0 }
0x18e8   :  { %v3340_v21 = vpop.f32.mrb[53].mxu0 }
0x18e9   :  { %v2173_v26 = vpop.f32.mrb[54].mxu0 }
0x18ea   :  { %v3341_v27 = vpop.f32.mrb[55].mxu0 }
0x18ef   :  { %v2218_v32 = vpop.f32.mrb[72].mxu1  ;;  %v2268_v37 = vpop.f32.mrb[56].mxu0 }
0x18f0   :  { %v3461_v39 = vpack.i.bf16 %v2218_v32, %v2170_v22  ;;  %v2324_v40 = vmul.f32 0.25, %v2268_v37  ;;  %v3346_v41 = vpop.f32.mrb[73].mxu1  ;;  %v3352_v42 = vpop.f32.mrb[57].mxu0 }
0x18f1   :  { %v2221_v43 = vpop.f32.mrb[74].mxu1  ;;  %v2271_v45 = vpop.f32.mrb[58].mxu0 }
0x18f2   :  { %v3347_v46 = vpop.f32.mrb[75].mxu1  ;;  %v3353_v24 = vpop.f32.mrb[59].mxu0  ;;  %v2326_v34 = vsel %vm274_vm4, %v2324_v40, -inf }
0x18f3   :  { %2327 = vmax.xlane.f32.xlu0 %v2326_v34 }
0x18f7   :  { %v2318_v47 = vpop.f32.mrb[76].mxu1 }
0x18f8   :  { %v2325_v48 = vmul.f32 0.25, %v2318_v47  ;;  %v3358_v49 = vpop.f32.mrb[77].mxu1 }
0x18f9   :  { %v2321_v9 = vpop.f32.mrb[78].mxu1 }
0x18fa   :  { %v3359_v10 = vpop.f32.mrb[79].mxu1  ;;  %v2329_v50 = vsel %vm274_vm4, %v2325_v48, -inf }
0x18fb   :  { %2330 = vmax.xlane.f32.xlu1 %v2329_v50 }
0x190c   :  { %2350 = vrot.lane.b32.xlu1 %v4120_v36, %s3644_s23 }
0x1910   :  { %3457 = vrot.lane.b32.xlu1 %v3456_v35, %s3643_s22 }
0x1914   :  { %3462 = vrot.lane.b32.xlu1 %v3461_v39, %s3641_s20 }
0x1980   :  { %v2328_v0 = vpop.xlane.xlu0 %2327 }
0x1981   :  { %v2332_v6 = vsub.f32 %v2324_v40, %v2328_v0 }
0x1983   :  { %v2334_v20 = vmul.f32 1.442695, %v2332_v6 }
0x1985   :  { %3595 = vpow2.f32 %v2334_v20 }
0x1988   :  { %v2331_v25 = vpop.xlane.xlu1 %2330 }
0x1989   :  { %v2333_v51 = vsub.f32 %v2325_v48, %v2331_v25 }
0x198b   :  { %v2336_v52 = vmul.f32 1.442695, %v2333_v51 }
0x198c   :  { %v2351_v53 = vpop.permute.xlu1 %2350 }
0x198d   :  { %3597 = vpow2.f32 %v2336_v52  ;;  %v2356_v54 = vsel %vm302_vm3, %v2351_v53, 0 }
0x198e   :  { %3361 = vmatpush3.bf16.msra.mxu0 %v2356_v54 }
0x198f   :  { %v3596_v36 = vpop.eup %3595  ;;  %3372 = vmatprep.subr.bf16.mxu0 %v3636_v14 }
0x1990   :  { %v2338_v2 = vsel %vm274_vm4, %v3596_v36, 0.0  ;;  %v3458_v32 = vpop.permute.xlu1 %3457 }
0x1991   :  { %2339 = vadd.xlane.f32.xlu0 %v2338_v2  ;;  %v3460_v39 = vunpack.i.h.bf16 %v3458_v32  ;;  %v3459_v40 = vunpack.i.l.bf16 %v3458_v32 }
0x1993   :  { %v2471_v45 = vsel %vm176_vm2, %v4178_v31, %v3460_v39  ;;  %v2470_v46 = vsel %vm176_vm2, %v4176_v23, %v3459_v40  ;;  %v4312_v23 = vld [vmem:[%s4438_s14] sm:$0x3f] }
0x1994   :  { %v3463_v37 = vpop.permute.xlu1 %3462  ;;  %v2488_v31 = vrot.slane %v4312_v23, %v3781_v15  ;;  %v2594_v40 = vrot.slane %v4312_v23, %v1210_v63  ;;  %v3526_v63 = vld [vmem:[%s4435_s11 + $0x38] sm:$0xff]  }
0x1995   :  { %v3465_v41 = vunpack.i.h.bf16 %v3463_v37  ;;  %v3464_v42 = vunpack.i.l.bf16 %v3463_v37 }
0x1997   :  { %v3598_v30 = vpop.eup %3597  ;;  %v2472_v47 = vsel %vm1086_vm5, %v2470_v46, %v3464_v42  ;;  %v2473_v48 = vsel %vm1086_vm5, %v2471_v45, %v3465_v41  ;;  %v3009_v46 = vld [vmem:[%s4437_s13] ss:$0 sm:$0xff] }
0x1998   :  { %v2341_v35 = vsel %vm274_vm4, %v3598_v30, 0.0 }
0x1999   :  { %2342 = vadd.xlane.f32.xlu0 %v2341_v35 }
0x19af   :  { %2398 = vrot.lane.b32.xlu0 %v4139_v44, %s3644_s23 }
0x1a1e   :  { %v2340_v55 = vpop.xlane.xlu0 %2339 }
0x1a1f   :  { %3599 = vrcp.f32 %v2340_v55 }
0x1a26   :  { %v2343_v38 = vpop.xlane.xlu0 %2342 }
0x1a27   :  { %3601 = vrcp.f32 %v2343_v38 }
0x1a29   :  { %v3600_v56 = vpop.eup %3599 }
0x1a2a   :  { %v2346_v28 = vmul.f32 %v3600_v56, %v3596_v36  ;;  %v2399_v57 = vpop.permute.xlu0 %2398 }
0x1a2b   :  { %v2404_v58 = vsel %vm302_vm3, %v2399_v57, 0 }
0x1a2c   :  { %3367 = vmatpush3.bf16.msra.mxu1 %v2404_v58  ;;  %v2348_v59 = vpack.c.bf16 %v2346_v28, %v2346_v28  ;;  %v3516_v58 = vld [vmem:[%s4434_s10 + $0x8] sm:$0xff]  }
0x1a2d   :  { %3384 = vmatprep.subr.bf16.mxu1 %v3636_v14 }
0x1a2e   :  { %3363 = vmatmul.mubr.msk.bf16.vlgmr.msra.gmra.mrb[60].mxu0 %vm274_vm4, %v2348_v59  ;;  %v3517_v59 = vld [vmem:[%s4434_s10 + $0x10] sm:$0xff]  }
0x1a2f   :  { %3380 = vmatprep.mubr.msk.bf16.mxu0 %vm3637_vm1, %v3636_v14  ;;  %3373 = vmatpush3.bf16.msra.mxu0 %v3511_v3  ;;  %v3521_v3 = vld [vmem:[%s4435_s11 + $0x10] sm:$0xff]  }
0x1a30   :  { %3374 = vmatprep.subr.bf16.mxu0 %v3636_v14 }
0x1a31   :  { %v3602_v60 = vpop.eup %3601 }
0x1a32   :  { %v2347_v44 = vmul.f32 %v3602_v60, %v3598_v30  ;;  %v3518_v60 = vld [vmem:[%s4434_s10 + $0x18] sm:$0xff]  }
0x1a33   :  { %3375 = vmatpush3.bf16.msra.mxu0 %v3512_v4  ;;  %v3522_v4 = vld [vmem:[%s4435_s11 + $0x18] sm:$0xff]  }
0x1a34   :  { %v2349_v62 = vpack.c.bf16 %v2347_v44, %v2347_v44  ;;  %3376 = vmatprep.subr.bf16.mxu0 %v3636_v14  ;;  %v3519_v44 = vld [vmem:[%s4435_s11] sm:$0xff]  }
0x1a36   :  { %3369 = vmatmul.mubr.msk.bf16.vlgmr.msra.gmra.mrb[80].mxu1 %vm274_vm4, %v2349_v62  ;;  %v3520_v62 = vld [vmem:[%s4435_s11 + $0x8] sm:$0xff]  }
0x1a37   :  { %3392 = vmatprep.mubr.msk.bf16.mxu1 %vm3637_vm1, %v3636_v14  ;;  %3377 = vmatpush3.bf16.msra.mxu0 %v3513_v29  ;;  %v3523_v29 = vld [vmem:[%s4435_s11 + $0x20] sm:$0xff]  }
0x1a38   :  { %3378 = vmatprep.subr.bf16.mxu0 %v3636_v14 }
0x1a3b   :  { %3379 = vmatpush3.bf16.msra.mxu0 %v3514_v5  ;;  %v3524_v5 = vld [vmem:[%s4435_s11 + $0x28] sm:$0xff]  }
0x1a3c   :  { %3396 = vmatprep.subr.bf16.mxu0 %v3636_v14 }
0x1b01   :  { %v2392_v7 = vpop.f32.mrb[60].mxu0 }
0x1b02   :  { %v3364_v8 = vpop.f32.mrb[61].mxu0 }
0x1b03   :  { %v2395_v11 = vpop.f32.mrb[62].mxu0 }
0x1b04   :  { %v3365_v12 = vpop.f32.mrb[63].mxu0 }
0x1b09   :  { %v2440_v19 = vpop.f32.mrb[80].mxu1 }
0x1b0a   :  { %v3466_v22 = vpack.i.bf16 %v2440_v19, %v2392_v7  ;;  %v3370_v21 = vpop.f32.mrb[81].mxu1 }
0x1b0b   :  { %v2443_v26 = vpop.f32.mrb[82].mxu1  ;;  %v2588_v21 = vrot.slane %v4312_v23, %v3792_v18  ;;  %v3525_v18 = vld [vmem:[%s4435_s11 + $0x30] sm:$0xff]  }
0x1b0c   :  { %3467 = vrot.lane.b32.xlu0 %v3466_v22, %s3639_s19  ;;  %v3371_v27 = vpop.f32.mrb[83].mxu1 }
0x1b7e   :  { %v3468_v43 = vpop.permute.xlu0 %3467 }
0x1b7f   :  { %v3470_v24 = vunpack.i.h.bf16 %v3468_v43  ;;  %v3469_v34 = vunpack.i.l.bf16 %v3468_v43 }
0x1b81   :  { %v2475_v49 = vsel %vm1089_vm6, %v2473_v48, %v3470_v24  ;;  %v2474_v9 = vsel %vm1089_vm6, %v2472_v47, %v3469_v34 }
0x1b82   :  { %v2476_v10 = vpack.c.bf16 %v2475_v49, %v2474_v9 }
0x1b84   :  { %3381 = vmatmul.mubr.msk.bf16.vlgmr.msra.gmra.mrb[64].mxu0 %vm122_vm0, %v2476_v10 }
0x1b85   :  { %3412 = vmatprep.mubr.msk.bf16.mxu0 %vm3637_vm1, %v3636_v14  ;;  %3397 = vmatpush3.bf16.msra.mxu0 %v3519_v44  ;;  %v3530_v44 = vld [vmem:[%s4439_s15 + $0x18] sm:$0xff]  }
0x1b86   :  { %3398 = vmatprep.subr.bf16.mxu0 %v3636_v14 }
0x1b89   :  { %3399 = vmatpush3.bf16.msra.mxu0 %v3520_v62 }
0x1b8a   :  { %3400 = vmatprep.subr.bf16.mxu0 %v3636_v14 }
0x1b8d   :  { %3401 = vmatpush3.bf16.msra.mxu0 %v3521_v3 }
0x1b8e   :  { %3402 = vmatprep.subr.bf16.mxu0 %v3636_v14 }
0x1b91   :  { %3403 = vmatpush3.bf16.msra.mxu0 %v3522_v4 }
0x1b92   :  { %3404 = vmatprep.subr.bf16.mxu0 %v3636_v14 }
0x1b95   :  { %3405 = vmatpush3.bf16.msra.mxu0 %v3523_v29 }
0x1b96   :  { %3406 = vmatprep.subr.bf16.mxu0 %v3636_v14 }
0x1b99   :  { %3407 = vmatpush3.bf16.msra.mxu0 %v3524_v5 }
0x1b9a   :  { %3408 = vmatprep.subr.bf16.mxu0 %v3636_v14 }
0x1b9d   :  { %3409 = vmatpush3.bf16.msra.mxu0 %v3525_v18 }
0x1b9e   :  { %3410 = vmatprep.subr.bf16.mxu0 %v3636_v14 }
0x1ba1   :  { %3411 = vmatpush3.bf16.msra.mxu0 %v3526_v63 }
0x1c57   :  { %v2550_v50 = vpop.f32.mrb[64].mxu0 }
0x1c58   :  { %v2551_v0 = vadd.f32 %v2550_v50, %v2488_v31  ;;  %v3382_v6 = vpop.f32.mrb[65].mxu0 }
0x1c59   :  { %v2553_v20 = vpop.f32.mrb[66].mxu0 }
0x1c5a   :  { %v2554_v25 = vadd.f32 %v2553_v20, %v2488_v31  ;;  %v3383_v51 = vpop.f32.mrb[67].mxu0  ;;  %v2557_v52 = vadd.f32 %v2551_v0, %v4104_v16  ;;  %v2703_v0 = vrot.slane %v4312_v23, %v1319_v33 }
0x1c5c   :  { %v2559_v53 = vsel %vm122_vm0, %v2557_v52, 0.0  ;;  %v2558_v54 = vadd.f32 %v2554_v25, %v4106_v17  ;;  %v3515_v17 = vld [vmem:[%s4434_s10] sm:$0xff]  }
0x1c5d   :  { %2560 = vadd.xlane.f32.xlu1 %v2559_v53  ;;  %3385 = vmatpush3.bf16.msra.mxu1 %v3515_v17 }
0x1c5e   :  { %v2562_v36 = vsel %vm122_vm0, %v2558_v54, 0.0  ;;  %3386 = vmatprep.subr.bf16.mxu1 %v3636_v14 }
0x1c5f   :  { %2563 = vadd.xlane.f32.xlu0 %v2562_v36 }
0x1c61   :  { %3387 = vmatpush3.bf16.msra.mxu1 %v3516_v58  ;;  %v3527_v58 = vld [vmem:[%s4439_s15] sm:$0xff]  }
0x1c62   :  { %3388 = vmatprep.subr.bf16.mxu1 %v3636_v14 }
0x1c65   :  { %3389 = vmatpush3.bf16.msra.mxu1 %v3517_v59  ;;  %v3528_v59 = vld [vmem:[%s4439_s15 + $0x8] sm:$0xff]  }
0x1c66   :  { %3390 = vmatprep.subr.bf16.mxu1 %v3636_v14 }
0x1c69   :  { %3391 = vmatpush3.bf16.msra.mxu1 %v3518_v60  ;;  %v3529_v60 = vld [vmem:[%s4439_s15 + $0x10] sm:$0xff]  }
0x1c6a   :  { %3416 = vmatprep.subr.bf16.mxu1 %v3636_v14 }
0x1cea   :  { %v2561_v2 = vpop.xlane.xlu1 %2560 }
0x1ceb   :  { %v2565_v30 = vmul.f32 0.015625, %v2561_v2 }
0x1cec   :  { %v2564_v35 = vpop.xlane.xlu0 %2563 }
0x1ced   :  { %v2567_v15 = vsub.f32 %v2557_v52, %v2565_v30  ;;  %v2566_v55 = vmul.f32 0.015625, %v2564_v35 }
0x1cef   :  { %v2568_v38 = vsub.f32 %v2558_v54, %v2566_v55  ;;  %v2569_v56 = vmul.f32 %v2567_v15, %v2567_v15 }
0x1cf1   :  { %v2571_v28 = vsel %vm122_vm0, %v2569_v56, 0.0  ;;  %v2570_v57 = vmul.f32 %v2568_v38, %v2568_v38 }
0x1cf2   :  { %2572 = vadd.xlane.f32.xlu0 %v2571_v28 }
0x1cf3   :  { %v2574_v16 = vsel %vm122_vm0, %v2570_v57, 0.0 }
0x1cf4   :  { %2575 = vadd.xlane.f32.xlu1 %v2574_v16 }
0x1d7f   :  { %v2573_v7 = vpop.xlane.xlu0 %2572 }
0x1d80   :  { %v2577_v8 = vmul.f32 0.015625, %v2573_v7 }
0x1d81   :  { %v2576_v11 = vpop.xlane.xlu1 %2575 }
0x1d82   :  { %v2579_v12 = vadd.f32 1e-05, %v2577_v8  ;;  %v2578_v19 = vmul.f32 0.015625, %v2576_v11  ;;  %v2824_v8 = vrot.slane %v4312_v23, %v1440_v61 }
0x1d84   :  { %3603 = vrsqrt.f32 %v2579_v12  ;;  %v2580_v22 = vadd.f32 1e-05, %v2578_v19 }
0x1d86   :  { %3605 = vrsqrt.f32 %v2580_v22 }
0x1d8e   :  { %v3604_v26 = vpop.eup %3603 }
0x1d8f   :  { %v2583_v27 = vmul.f32 %v3604_v26, %v2567_v15 }
0x1d90   :  { %v3606_v32 = vpop.eup %3605 }
0x1d91   :  { %v2589_v37 = vmul.f32 %v2588_v21, %v2583_v27  ;;  %v2584_v39 = vmul.f32 %v3606_v32, %v2568_v38 }
0x1d93   :  { %v2590_v41 = vmul.f32 %v2588_v21, %v2584_v39  ;;  %v2595_v42 = vadd.f32 %v2594_v40, %v2589_v37  ;;  %v3023_v39 = vld [vmem:[%s4440_s16] ss:$0 sm:$0xff] }
0x1d95   :  { %v2596_v43 = vadd.f32 %v2594_v40, %v2590_v41 }
0x1d97   :  { %v2597_v45 = vpack.c.bf16 %v2596_v43, %v2595_v42 }
0x1d99   :  { %3393 = vmatmul.mubr.msk.bf16.vlgmr.msra.gmra.mrb[84].mxu1 %vm122_vm0, %v2597_v45 }
0x1d9a   :  { %3424 = vmatprep.mubr.msk.bf16.mxu1 %vm3637_vm1, %v3636_v14  ;;  %3417 = vmatpush3.bf16.msra.mxu1 %v3527_v58 }
0x1d9b   :  { %3418 = vmatprep.subr.bf16.mxu1 %v3636_v14 }
0x1d9e   :  { %3419 = vmatpush3.bf16.msra.mxu1 %v3528_v59 }
0x1d9f   :  { %3420 = vmatprep.subr.bf16.mxu1 %v3636_v14 }
0x1da2   :  { %3421 = vmatpush3.bf16.msra.mxu1 %v3529_v60 }
0x1da3   :  { %3422 = vmatprep.subr.bf16.mxu1 %v3636_v14  ;;  %v2830_v14 = vrot.slane %v4312_v23, %v1446_v1 }
0x1da6   :  { %3423 = vmatpush3.bf16.msra.mxu1 %v3530_v44 }
0x1e6c   :  { %v2674_v24 = vpop.f32.mrb[84].mxu1 }
0x1e6d   :  { %v2675_v34 = vadd.f32 %v3009_v46, %v2674_v24  ;;  %v3394_v47 = vpop.f32.mrb[85].mxu1 }
0x1e6e   :  { %v2677_v48 = vpop.f32.mrb[86].mxu1 }
0x1e6f   :  { %v2678_v49 = vadd.f32 %v3009_v46, %v2677_v48  ;;  %v3395_v9 = vpop.f32.mrb[87].mxu1  ;;  %v2681_v10 = vmax.f32 %v2675_v34, 0.0 }
0x1e71   :  { %v2682_v31 = vmax.f32 %v2678_v49, 0.0 }
0x1e73   :  { %v2683_v50 = vpack.c.bf16 %v2682_v31, %v2681_v10 }
0x1e75   :  { %3413 = vmatmul.mubr.bf16.vlgmr.msra.gmra.mrb[68].mxu0 %v2683_v50 }
0x1f48   :  { %v2786_v6 = vpop.f32.mrb[68].mxu0 }
0x1f49   :  { %v2787_v20 = vadd.f32 %v2786_v6, %v2703_v0  ;;  %v3414_v25 = vpop.f32.mrb[69].mxu0 }
0x1f4a   :  { %v2789_v51 = vpop.f32.mrb[70].mxu0 }
0x1f4b   :  { %v2790_v52 = vadd.f32 %v2789_v51, %v2703_v0  ;;  %v3415_v53 = vpop.f32.mrb[71].mxu0  ;;  %v2793_v54 = vadd.f32 %v2787_v20, %v2595_v42 }
0x1f4d   :  { %v2795_v36 = vsel %vm122_vm0, %v2793_v54, 0.0  ;;  %v2794_v2 = vadd.f32 %v2790_v52, %v2596_v43 }
0x1f4e   :  { %2796 = vadd.xlane.f32.xlu0 %v2795_v36 }
0x1f4f   :  { %v2798_v30 = vsel %vm122_vm0, %v2794_v2, 0.0 }
0x1f50   :  { %2799 = vadd.xlane.f32.xlu1 %v2798_v30 }
0x1fdb   :  { %v2797_v35 = vpop.xlane.xlu0 %2796 }
0x1fdc   :  { %v2801_v15 = vmul.f32 0.015625, %v2797_v35 }
0x1fdd   :  { %v2800_v55 = vpop.xlane.xlu1 %2799 }
0x1fde   :  { %v2803_v38 = vsub.f32 %v2793_v54, %v2801_v15  ;;  %v2802_v56 = vmul.f32 0.015625, %v2800_v55 }
0x1fe0   :  { %v2804_v33 = vsub.f32 %v2794_v2, %v2802_v56  ;;  %v2805_v28 = vmul.f32 %v2803_v38, %v2803_v38 }
0x1fe2   :  { %v2807_v57 = vsel %vm122_vm0, %v2805_v28, 0.0  ;;  %v2806_v16 = vmul.f32 %v2804_v33, %v2804_v33 }
0x1fe3   :  { %2808 = vadd.xlane.f32.xlu0 %v2807_v57 }
0x1fe4   :  { %v2810_v17 = vsel %vm122_vm0, %v2806_v16, 0.0 }
0x1fe5   :  { %2811 = vadd.xlane.f32.xlu1 %v2810_v17 }
0x2070   :  { %v2809_v62 = vpop.xlane.xlu0 %2808 }
0x2071   :  { %v2813_v3 = vmul.f32 0.015625, %v2809_v62 }
0x2072   :  { %v2812_v4 = vpop.xlane.xlu1 %2811 }
0x2073   :  { %v2815_v29 = vadd.f32 1e-05, %v2813_v3  ;;  %v2814_v5 = vmul.f32 0.015625, %v2812_v4 }
0x2075   :  { %3607 = vrsqrt.f32 %v2815_v29  ;;  %v2816_v7 = vadd.f32 1e-05, %v2814_v5 }
0x2077   :  { %3609 = vrsqrt.f32 %v2816_v7 }
0x207f   :  { %v3608_v11 = vpop.eup %3607 }
0x2080   :  { %v2819_v12 = vmul.f32 %v3608_v11, %v2803_v38 }
0x2081   :  { %v3610_v19 = vpop.eup %3609 }
0x2082   :  { %v2825_v22 = vmul.f32 %v2824_v8, %v2819_v12  ;;  %v2820_v21 = vmul.f32 %v3610_v19, %v2804_v33 }
0x2084   :  { %v2826_v26 = vmul.f32 %v2824_v8, %v2820_v21  ;;  %v2831_v27 = vadd.f32 %v2830_v14, %v2825_v22 }
0x2086   :  { %v2832_v32 = vadd.f32 %v2830_v14, %v2826_v26 }
0x2088   :  { %v2833_v37 = vpack.c.bf16 %v2832_v32, %v2831_v27 }
0x208a   :  { %3425 = vmatmul.mubr.msk.bf16.vlgmr.msra.gmra.mrb[88].mxu1 %vm122_vm0, %v2833_v37 }
0x215d   :  { %v2910_v61 = vpop.f32.mrb[88].mxu1 }
0x215e   :  { %v2911_v40 = vadd.f32 %v3023_v39, %v2910_v61  ;;  %v3426_v41 = vpop.f32.mrb[89].mxu1 }
0x215f   :  { %v2913_v42 = vpop.f32.mrb[90].mxu1 }
0x2160   :  { %2917 = vst [vmem:[#allocation2] sm:$0xff] %v2911_v40  ;;  %v2914_v13 = vadd.f32 %v3023_v39, %v2913_v42  ;;  %v3427_v43 = vpop.f32.mrb[91].mxu1 }
0x2162   :  { %2918 = vst [vmem:[#allocation2 + $0x8] sm:$0xff] %v2914_v13 }
0x2163   :  { %3622 = shalt.err (!%p3619_p4)
}
0x2164   :  { %s3623_s4 = scalar_lea.hbm %s4441_s17, 256 }
0x2165   :  { %p3624_p5 = scmp.ne.s32.totalorder %s4441_s17, %s3623_s4  ;;  %p3627_p6 = scmp.lt.u32.totalorder %s3623_s4, %s4441_s17 }
0x2167   :  { %p3629_p7 = pnand %p3627_p6, %p3624_p5 }
0x2169   :  { %3632 = shalt.err (!%p3629_p7)
}
0x216a   :  { %s3646_s12 = smov 128   ;;  %s3647_s5 = smov 8  }
0x216b   :  { %2930 = dma.vmem_to_hbm [thread:$0]  %s2925_s7, 256, %s4441_s17, [#allocation3], %s3646_s12, %s3646_s12, %s3647_s5  }
0x216c   :  { %3633 = dma.done.wait [#allocation3], 256  }
0x216d   :  { %3634 = vsyncadd [#allocation3], 4294967040 }
0x216e   :  { %2934 = vsyncpa [#allocation3], 1 }

</bundles_post_ra>
